<compile_context>
chip_gen: v7x
topology: tpu7x:2x2x1
jax: 0.10.0
libtpu: 0.0.40
codegen_flags: <defaults>
</compile_context>

<pallas_src>
from functools import partial

import jax
import jax.numpy as jnp
from jax.experimental import pallas as pl
from jax.experimental.pallas import tpu as pltpu

# ----------------------------- config (small, MLA-consistent) ----------------
HIDDEN = 64          # config.hidden_size
NUM_HEADS = 2        # config.num_attention_heads (== num_key_value_heads)
Q_LORA = 32          # config.q_lora_rank
KV_LORA = 32         # config.kv_lora_rank
QK_ROPE = 16         # config.qk_rope_head_dim
QK_NOPE = 32         # config.qk_nope_head_dim
V_HEAD = 32          # config.v_head_dim
QK_HEAD = QK_NOPE + QK_ROPE        # 48
NOPE_V = QK_NOPE + V_HEAD          # per-head kv_b output width = 64
INTER = 128          # config.intermediate_size
EPS = 1e-6           # config.rms_norm_eps (and MLARMSNorm default)
ROPE_THETA = 10000.0
SCALING = QK_HEAD ** (-0.5)        # rope_scaling is None -> no yarn mscale
B, S = 2, 8


# ----------------------------- fused decoder-layer kernel --------------------
def _mla_layer_kernel(x_ref, ln1_ref, qa_kva_ref, q_a_ln_ref, q_b_ref,
                      kv_a_ln_ref, kv_b_ref, o_w_ref, ln2_ref, gate_up_ref,
                      down_ref, cos_ref, sin_ref, out_ref, *, scaling, eps):
    f32 = jnp.float32
    x = x_ref[...].astype(f32)                                   # (S, D)

    def rms(v, w_ref):
        var = jnp.mean(v * v, axis=-1, keepdims=True)
        return w_ref[...] * (v * jax.lax.rsqrt(var + eps))

    # ---- input_layernorm
    h = rms(x, ln1_ref)                                          # (S, D)

    # ---- fused q_a / kv_a projection off the same normed input
    qa_kva = jnp.dot(h, qa_kva_ref[...], preferred_element_type=f32)   # (S, 80)
    q_a = rms(qa_kva[:, :Q_LORA], q_a_ln_ref)                    # (S, 32)
    kv_a = rms(qa_kva[:, Q_LORA:Q_LORA + KV_LORA], kv_a_ln_ref)  # (S, 32)
    k_rot = qa_kva[:, Q_LORA + KV_LORA:]                         # (S, 16)

    q_all = jnp.dot(q_a, q_b_ref[...], preferred_element_type=f32)     # (S, H*48)
    kv_all = jnp.dot(kv_a, kv_b_ref[...], preferred_element_type=f32)  # (S, H*64)

    # ---- RoPE (non-interleaved path of the module)
    cos = cos_ref[...]                                           # (S, 16)
    sin = sin_ref[...]
    half = QK_ROPE // 2

    def rope(t):
        rot = jnp.concatenate([-t[:, half:], t[:, :half]], axis=-1)
        return t * cos + rot * sin

    k_rot = rope(k_rot)                                          # shared across heads

    # ---- causal mask built in-kernel (no mask DMA)
    row = jax.lax.broadcasted_iota(jnp.int32, (x.shape[0], x.shape[0]), 0)
    col = jax.lax.broadcasted_iota(jnp.int32, (x.shape[0], x.shape[0]), 1)
    causal = col <= row
    ddims = (((1,), (1,)), ((), ()))                             # q @ k.T

    o_w = o_w_ref[...]                                           # (H*V_HEAD, D)
    attn_proj = jnp.zeros((x.shape[0], o_w.shape[1]), f32)       # (S, D)

    for hd in range(NUM_HEADS):                                  # static unroll
        q_h = q_all[:, hd * QK_HEAD:(hd + 1) * QK_HEAD]
        q_nope = q_h[:, :QK_NOPE]
        q_rot = rope(q_h[:, QK_NOPE:])
        k_nope = kv_all[:, hd * NOPE_V: hd * NOPE_V + QK_NOPE]
        v_h = kv_all[:, hd * NOPE_V + QK_NOPE:(hd + 1) * NOPE_V]

        # scores over concat([nope, rope]) == sum of the two partial dots
        scores = (jax.lax.dot_general(q_nope, k_nope, ddims,
                                      preferred_element_type=f32)
                  + jax.lax.dot_general(q_rot, k_rot, ddims,
                                        preferred_element_type=f32)) * scaling
        scores = jnp.where(causal, scores, -1e30)
        scores = scores - jnp.max(scores, axis=-1, keepdims=True)
        p = jnp.exp(scores)
        p = p * pl.reciprocal(jnp.sum(p, axis=-1, keepdims=True), approx=True)

        o_h = jnp.dot(p, v_h, preferred_element_type=f32)        # (S, V_HEAD)
        # per-head slice of o_proj, accumulated (avoids head concat)
        attn_proj = attn_proj + jnp.dot(
            o_h, o_w[hd * V_HEAD:(hd + 1) * V_HEAD, :],
            preferred_element_type=f32)

    # ---- residual + post_attention_layernorm + fused gated MLP + residual
    h1 = x + attn_proj
    h2 = rms(h1, ln2_ref)
    gu = jnp.dot(h2, gate_up_ref[...], preferred_element_type=f32)      # (S, 2*INTER)
    g = gu[:, :INTER]
    u = gu[:, INTER:]
    act = (g * jax.nn.sigmoid(g)) * u                            # SiLU(gate) * up
    mlp = jnp.dot(act, down_ref[...], preferred_element_type=f32)
    out_ref[...] = (h1 + mlp).astype(out_ref.dtype)


def mla_decoder_layer_pallas(x, p, cos, sin):
    Bx, Sx, D = x.shape
    x2 = x.reshape(Bx * Sx, D)

    # weight fusions (done once, outside the kernel)
    qa_kva_w = jnp.concatenate([p["q_a_proj"], p["kv_a_proj"]], axis=1)   # (D, 80)
    gate_up_w = jnp.concatenate([p["gate_proj"], p["up_proj"]], axis=1)   # (D, 2*INTER)

    n_qb = NUM_HEADS * QK_HEAD
    n_kvb = NUM_HEADS * NOPE_V

    kernel = partial(_mla_layer_kernel, scaling=SCALING, eps=EPS)
    out = pl.pallas_call(
        kernel,
        out_shape=jax.ShapeDtypeStruct((Bx * Sx, D), x.dtype),
        grid=(Bx,),
        in_specs=[
            pl.BlockSpec((Sx, D), lambda b: (b, 0)),                        # x rows of batch b
            pl.BlockSpec((1, D), lambda b: (0, 0)),                         # input_ln_w
            pl.BlockSpec((D, Q_LORA + KV_LORA + QK_ROPE), lambda b: (0, 0)),  # fused q_a|kv_a
            pl.BlockSpec((1, Q_LORA), lambda b: (0, 0)),                    # q_a_ln_w
            pl.BlockSpec((Q_LORA, n_qb), lambda b: (0, 0)),                 # q_b_proj
            pl.BlockSpec((1, KV_LORA), lambda b: (0, 0)),                   # kv_a_ln_w
            pl.BlockSpec((KV_LORA, n_kvb), lambda b: (0, 0)),               # kv_b_proj
            pl.BlockSpec((NUM_HEADS * V_HEAD, D), lambda b: (0, 0)),        # o_proj
            pl.BlockSpec((1, D), lambda b: (0, 0)),                         # post_ln_w
            pl.BlockSpec((D, 2 * INTER), lambda b: (0, 0)),                 # fused gate|up
            pl.BlockSpec((INTER, D), lambda b: (0, 0)),                     # down_proj
            pl.BlockSpec((Sx, QK_ROPE), lambda b: (0, 0)),                  # cos
            pl.BlockSpec((Sx, QK_ROPE), lambda b: (0, 0)),                  # sin
        ],
        out_specs=pl.BlockSpec((Sx, D), lambda b: (b, 0)),
        compiler_params=pltpu.CompilerParams(
            dimension_semantics=("parallel",),
        ),
    )(x2, p["input_ln_w"].reshape(1, D), qa_kva_w,
      p["q_a_ln_w"].reshape(1, Q_LORA), p["q_b_proj"],
      p["kv_a_ln_w"].reshape(1, KV_LORA), p["kv_b_proj"], p["o_proj"],
      p["post_ln_w"].reshape(1, D), gate_up_w, p["down_proj"], cos, sin)
    return out.reshape(Bx, Sx, D)


# ----------------------------- pure-JAX reference -----------------------------
def mla_decoder_layer_ref(x, p, cos, sin):
    Bx, Sx, D = x.shape

    def rms(v, w, eps=EPS):
        vf = v.astype(jnp.float32)
        var = jnp.mean(vf * vf, axis=-1, keepdims=True)
        return w * (vf * jax.lax.rsqrt(var + eps))

    def rotate_half(t):
        h = t.shape[-1] // 2
        return jnp.concatenate([-t[..., h:], t[..., :h]], axis=-1)

    h = rms(x, p["input_ln_w"])
    q = rms(h @ p["q_a_proj"], p["q_a_ln_w"]) @ p["q_b_proj"]
    q = q.reshape(Bx, Sx, NUM_HEADS, QK_HEAD).transpose(0, 2, 1, 3)
    q_pass, q_rot = q[..., :QK_NOPE], q[..., QK_NOPE:]

    ckv = h @ p["kv_a_proj"]
    k_pass_c, k_rot = ckv[..., :KV_LORA], ckv[..., KV_LORA:]
    kv = rms(k_pass_c, p["kv_a_ln_w"]) @ p["kv_b_proj"]
    kv = kv.reshape(Bx, Sx, NUM_HEADS, NOPE_V).transpose(0, 2, 1, 3)
    k_pass, v = kv[..., :QK_NOPE], kv[..., QK_NOPE:]

    k_rot = k_rot.reshape(Bx, 1, Sx, QK_ROPE)
    cos4, sin4 = cos[None, None], sin[None, None]
    q_rot = q_rot * cos4 + rotate_half(q_rot) * sin4
    k_rot = k_rot * cos4 + rotate_half(k_rot) * sin4
    k_rot = jnp.broadcast_to(k_rot, k_pass.shape[:-1] + (QK_ROPE,))

    qs = jnp.concatenate([q_pass, q_rot], axis=-1)
    ks = jnp.concatenate([k_pass, k_rot], axis=-1)
    scores = jnp.einsum("bhqd,bhkd->bhqk", qs, ks) * SCALING
    causal = jnp.tril(jnp.ones((Sx, Sx), bool))
    scores = jnp.where(causal[None, None], scores, -1e30)
    pr = jax.nn.softmax(scores.astype(jnp.float32), axis=-1)
    attn = jnp.einsum("bhqk,bhkd->bhqd", pr, v)
    attn = attn.transpose(0, 2, 1, 3).reshape(Bx, Sx, NUM_HEADS * V_HEAD) @ p["o_proj"]
    h1 = x + attn
    h2 = rms(h1, p["post_ln_w"])
    mlp = (jax.nn.silu(h2 @ p["gate_proj"]) * (h2 @ p["up_proj"])) @ p["down_proj"]
    return h1 + mlp


# ----------------------------- driver -----------------------------------------
if __name__ == "__main__":
    key = jax.random.PRNGKey(0)
    keys = jax.random.split(key, 12)

    def init(k, shape, scale=0.02):
        return scale * jax.random.normal(k, shape, dtype=jnp.float32)

    params = {
        "input_ln_w": jnp.ones((HIDDEN,), jnp.float32),
        "post_ln_w": jnp.ones((HIDDEN,), jnp.float32),
        "q_a_proj": init(keys[0], (HIDDEN, Q_LORA)),
        "q_a_ln_w": jnp.ones((Q_LORA,), jnp.float32),
        "q_b_proj": init(keys[1], (Q_LORA, NUM_HEADS * QK_HEAD)),
        "kv_a_proj": init(keys[2], (HIDDEN, KV_LORA + QK_ROPE)),
        "kv_a_ln_w": jnp.ones((KV_LORA,), jnp.float32),
        "kv_b_proj": init(keys[3], (KV_LORA, NUM_HEADS * NOPE_V)),
        "o_proj": init(keys[4], (NUM_HEADS * V_HEAD, HIDDEN)),
        "gate_proj": init(keys[5], (HIDDEN, INTER)),
        "up_proj": init(keys[6], (HIDDEN, INTER)),
        "down_proj": init(keys[7], (INTER, HIDDEN)),
    }

    x = jax.random.normal(keys[8], (B, S, HIDDEN), dtype=jnp.float32)

    # rotary position embeddings for qk_rope_head_dim (same positions per batch)
    inv_freq = 1.0 / (
        ROPE_THETA ** (jnp.arange(0, QK_ROPE, 2, dtype=jnp.float32) / QK_ROPE)
    )
    pos = jnp.arange(S, dtype=jnp.float32)
    freqs = jnp.outer(pos, inv_freq)                        # (S, QK_ROPE//2)
    emb = jnp.concatenate([freqs, freqs], axis=-1)          # (S, QK_ROPE)
    cos = jnp.cos(emb).astype(jnp.float32)
    sin = jnp.sin(emb).astype(jnp.float32)

    out_pallas = jax.block_until_ready(mla_decoder_layer_pallas(x, params, cos, sin))
    out_ref = jax.block_until_ready(mla_decoder_layer_ref(x, params, cos, sin))

    assert out_pallas.shape == (B, S, HIDDEN)
    max_err = float(jnp.max(jnp.abs(out_pallas - out_ref)))
    assert max_err < 1e-3, f"mismatch vs reference: max_err={max_err}"

    print("KERNEL_OK")
</pallas_src>

<mosaic_0001>
module attributes {stable_mosaic.version = 11 : i64} {
  func.func @_mla_layer_kernel(%arg0: i32, %arg1: memref<8x64xf32, #tpu.memory_space<vmem>>, %arg2: memref<1x64xf32, #tpu.memory_space<vmem>>, %arg3: memref<64x80xf32, #tpu.memory_space<vmem>>, %arg4: memref<1x32xf32, #tpu.memory_space<vmem>>, %arg5: memref<32x96xf32, #tpu.memory_space<vmem>>, %arg6: memref<1x32xf32, #tpu.memory_space<vmem>>, %arg7: memref<32x128xf32, #tpu.memory_space<vmem>>, %arg8: memref<64x64xf32, #tpu.memory_space<vmem>>, %arg9: memref<1x64xf32, #tpu.memory_space<vmem>>, %arg10: memref<64x256xf32, #tpu.memory_space<vmem>>, %arg11: memref<128x64xf32, #tpu.memory_space<vmem>>, %arg12: memref<8x16xf32, #tpu.memory_space<vmem>>, %arg13: memref<8x16xf32, #tpu.memory_space<vmem>>, %arg14: memref<8x64xf32, #tpu.memory_space<vmem>>) attributes {dimension_semantics = [#tpu.dimension_semantics<parallel>], iteration_bounds = array<i64: 2>, scalar_prefetch = 0 : i64, scratch_operands = 0 : i64, tpu.core_type = #tpu.core_type<tc>, window_params = [{transform_indices = @transform_0, window_bounds = array<i64: 8, 64>}, {pipeline_mode = #tpu.pipeline_mode<synchronous>, transform_indices = @transform_1, window_bounds = array<i64: 1, 64>}, {pipeline_mode = #tpu.pipeline_mode<synchronous>, transform_indices = @transform_2, window_bounds = array<i64: 64, 80>}, {pipeline_mode = #tpu.pipeline_mode<synchronous>, transform_indices = @transform_3, window_bounds = array<i64: 1, 32>}, {pipeline_mode = #tpu.pipeline_mode<synchronous>, transform_indices = @transform_4, window_bounds = array<i64: 32, 96>}, {pipeline_mode = #tpu.pipeline_mode<synchronous>, transform_indices = @transform_5, window_bounds = array<i64: 1, 32>}, {pipeline_mode = #tpu.pipeline_mode<synchronous>, transform_indices = @transform_6, window_bounds = array<i64: 32, 128>}, {pipeline_mode = #tpu.pipeline_mode<synchronous>, transform_indices = @transform_7, window_bounds = array<i64: 64, 64>}, {pipeline_mode = #tpu.pipeline_mode<synchronous>, transform_indices = @transform_8, window_bounds = array<i64: 1, 64>}, {pipeline_mode = #tpu.pipeline_mode<synchronous>, transform_indices = @transform_9, window_bounds = array<i64: 64, 256>}, {pipeline_mode = #tpu.pipeline_mode<synchronous>, transform_indices = @transform_10, window_bounds = array<i64: 128, 64>}, {pipeline_mode = #tpu.pipeline_mode<synchronous>, transform_indices = @transform_11, window_bounds = array<i64: 8, 16>}, {pipeline_mode = #tpu.pipeline_mode<synchronous>, transform_indices = @transform_12, window_bounds = array<i64: 8, 16>}, {transform_indices = @transform_13, window_bounds = array<i64: 8, 64>}]} {
    %c0 = arith.constant 0 : index
    %c0_0 = arith.constant 0 : index
    %0 = vector.load %arg1[%c0, %c0_0] : memref<8x64xf32, #tpu.memory_space<vmem>>, vector<8x64xf32>
    %1 = arith.mulf %0, %0 : vector<8x64xf32>
    %cst = arith.constant dense<0.000000e+00> : vector<8xf32>
    %2 = vector.multi_reduction <add>, %1, %cst [1] : vector<8x64xf32> to vector<8xf32>
    %3 = vector.shape_cast %2 : vector<8xf32> to vector<8x1xf32>
    %cst_1 = arith.constant 6.400000e+01 : f32
    %4 = vector.broadcast %cst_1 : f32 to vector<8x1xf32>
    %5 = arith.divf %3, %4 : vector<8x1xf32>
    %c0_2 = arith.constant 0 : index
    %c0_3 = arith.constant 0 : index
    %6 = vector.load %arg2[%c0_2, %c0_3] : memref<1x64xf32, #tpu.memory_space<vmem>>, vector<1x64xf32>
    %cst_4 = arith.constant 9.99999997E-7 : f32
    %7 = vector.broadcast %cst_4 : f32 to vector<8x1xf32>
    %8 = arith.addf %5, %7 : vector<8x1xf32>
    %9 = math.rsqrt %8 : vector<8x1xf32>
    %10 = vector.broadcast %9 : vector<8x1xf32> to vector<8x64xf32>
    %11 = arith.mulf %0, %10 : vector<8x64xf32>
    %12 = vector.broadcast %6 : vector<1x64xf32> to vector<8x64xf32>
    %13 = arith.mulf %12, %11 : vector<8x64xf32>
    %c0_5 = arith.constant 0 : index
    %c0_6 = arith.constant 0 : index
    %14 = vector.load %arg3[%c0_5, %c0_6] : memref<64x80xf32, #tpu.memory_space<vmem>>, vector<64x80xf32>
    %cst_7 = arith.constant dense<0.000000e+00> : vector<8x80xf32>
    %15 = tpu.matmul %13, %14, %cst_7 {dimension_numbers = #tpu.dot_dimension_numbers<[1], [0], [0], [1], [0, 0, 1, 1], [], []>} : vector<8x64xf32>, vector<64x80xf32>, vector<8x80xf32> -> vector<8x80xf32>
    %16 = vector.extract_strided_slice %15 {offsets = [0, 0], sizes = [8, 32], strides = [1, 1]} : vector<8x80xf32> to vector<8x32xf32>
    %17 = arith.mulf %16, %16 : vector<8x32xf32>
    %cst_8 = arith.constant dense<0.000000e+00> : vector<8xf32>
    %18 = vector.multi_reduction <add>, %17, %cst_8 [1] : vector<8x32xf32> to vector<8xf32>
    %19 = vector.shape_cast %18 : vector<8xf32> to vector<8x1xf32>
    %cst_9 = arith.constant 3.200000e+01 : f32
    %20 = vector.broadcast %cst_9 : f32 to vector<8x1xf32>
    %21 = arith.divf %19, %20 : vector<8x1xf32>
    %c0_10 = arith.constant 0 : index
    %c0_11 = arith.constant 0 : index
    %22 = vector.load %arg4[%c0_10, %c0_11] : memref<1x32xf32, #tpu.memory_space<vmem>>, vector<1x32xf32>
    %cst_12 = arith.constant 9.99999997E-7 : f32
    %23 = vector.broadcast %cst_12 : f32 to vector<8x1xf32>
    %24 = arith.addf %21, %23 : vector<8x1xf32>
    %25 = math.rsqrt %24 : vector<8x1xf32>
    %26 = vector.broadcast %25 : vector<8x1xf32> to vector<8x32xf32>
    %27 = arith.mulf %16, %26 : vector<8x32xf32>
    %28 = vector.broadcast %22 : vector<1x32xf32> to vector<8x32xf32>
    %29 = arith.mulf %28, %27 : vector<8x32xf32>
    %30 = vector.extract_strided_slice %15 {offsets = [0, 32], sizes = [8, 32], strides = [1, 1]} : vector<8x80xf32> to vector<8x32xf32>
    %31 = arith.mulf %30, %30 : vector<8x32xf32>
    %cst_13 = arith.constant dense<0.000000e+00> : vector<8xf32>
    %32 = vector.multi_reduction <add>, %31, %cst_13 [1] : vector<8x32xf32> to vector<8xf32>
    %33 = vector.shape_cast %32 : vector<8xf32> to vector<8x1xf32>
    %cst_14 = arith.constant 3.200000e+01 : f32
    %34 = vector.broadcast %cst_14 : f32 to vector<8x1xf32>
    %35 = arith.divf %33, %34 : vector<8x1xf32>
    %c0_15 = arith.constant 0 : index
    %c0_16 = arith.constant 0 : index
    %36 = vector.load %arg6[%c0_15, %c0_16] : memref<1x32xf32, #tpu.memory_space<vmem>>, vector<1x32xf32>
    %cst_17 = arith.constant 9.99999997E-7 : f32
    %37 = vector.broadcast %cst_17 : f32 to vector<8x1xf32>
    %38 = arith.addf %35, %37 : vector<8x1xf32>
    %39 = math.rsqrt %38 : vector<8x1xf32>
    %40 = vector.broadcast %39 : vector<8x1xf32> to vector<8x32xf32>
    %41 = arith.mulf %30, %40 : vector<8x32xf32>
    %42 = vector.broadcast %36 : vector<1x32xf32> to vector<8x32xf32>
    %43 = arith.mulf %42, %41 : vector<8x32xf32>
    %44 = vector.extract_strided_slice %15 {offsets = [0, 64], sizes = [8, 16], strides = [1, 1]} : vector<8x80xf32> to vector<8x16xf32>
    %c0_18 = arith.constant 0 : index
    %c0_19 = arith.constant 0 : index
    %45 = vector.load %arg5[%c0_18, %c0_19] : memref<32x96xf32, #tpu.memory_space<vmem>>, vector<32x96xf32>
    %cst_20 = arith.constant dense<0.000000e+00> : vector<8x96xf32>
    %46 = tpu.matmul %29, %45, %cst_20 {dimension_numbers = #tpu.dot_dimension_numbers<[1], [0], [0], [1], [0, 0, 1, 1], [], []>} : vector<8x32xf32>, vector<32x96xf32>, vector<8x96xf32> -> vector<8x96xf32>
    %c0_21 = arith.constant 0 : index
    %c0_22 = arith.constant 0 : index
    %47 = vector.load %arg7[%c0_21, %c0_22] : memref<32x128xf32, #tpu.memory_space<vmem>>, vector<32x128xf32>
    %cst_23 = arith.constant dense<0.000000e+00> : vector<8x128xf32>
    %48 = tpu.matmul %43, %47, %cst_23 {dimension_numbers = #tpu.dot_dimension_numbers<[1], [0], [0], [1], [0, 0, 1, 1], [], []>} : vector<8x32xf32>, vector<32x128xf32>, vector<8x128xf32> -> vector<8x128xf32>
    %c0_24 = arith.constant 0 : index
    %c0_25 = arith.constant 0 : index
    %49 = vector.load %arg12[%c0_24, %c0_25] : memref<8x16xf32, #tpu.memory_space<vmem>>, vector<8x16xf32>
    %c0_26 = arith.constant 0 : index
    %c0_27 = arith.constant 0 : index
    %50 = vector.load %arg13[%c0_26, %c0_27] : memref<8x16xf32, #tpu.memory_space<vmem>>, vector<8x16xf32>
    %51 = vector.extract_strided_slice %44 {offsets = [0, 8], sizes = [8, 8], strides = [1, 1]} : vector<8x16xf32> to vector<8x8xf32>
    %cst_28 = arith.constant 0.000000e+00 : f32
    %52 = vector.broadcast %cst_28 : f32 to vector<8x8xf32>
    %53 = arith.subf %52, %51 : vector<8x8xf32>
    %54 = vector.extract_strided_slice %44 {offsets = [0, 0], sizes = [8, 8], strides = [1, 1]} : vector<8x16xf32> to vector<8x8xf32>
    %55 = tpu.concatenate %53, %54 in 1 : vector<8x8xf32>, vector<8x8xf32> -> vector<8x16xf32>
    %56 = arith.mulf %44, %49 : vector<8x16xf32>
    %57 = arith.mulf %55, %50 : vector<8x16xf32>
    %58 = arith.addf %56, %57 : vector<8x16xf32>
    %59 = tpu.iota {dimensions = array<i32: 0>} : vector<8x8xi32>
    %60 = tpu.iota {dimensions = array<i32: 1>} : vector<8x8xi32>
    %61 = arith.cmpi sle, %60, %59 : vector<8x8xi32>
    %c0_29 = arith.constant 0 : index
    %c0_30 = arith.constant 0 : index
    %62 = vector.load %arg8[%c0_29, %c0_30] : memref<64x64xf32, #tpu.memory_space<vmem>>, vector<64x64xf32>
    %cst_31 = arith.constant 0.000000e+00 : f32
    %63 = vector.broadcast %cst_31 : f32 to vector<8x64xf32>
    %64 = vector.extract_strided_slice %46 {offsets = [0, 0], sizes = [8, 48], strides = [1, 1]} : vector<8x96xf32> to vector<8x48xf32>
    %65 = vector.extract_strided_slice %64 {offsets = [0, 0], sizes = [8, 32], strides = [1, 1]} : vector<8x48xf32> to vector<8x32xf32>
    %66 = vector.extract_strided_slice %64 {offsets = [0, 32], sizes = [8, 16], strides = [1, 1]} : vector<8x48xf32> to vector<8x16xf32>
    %67 = vector.extract_strided_slice %66 {offsets = [0, 8], sizes = [8, 8], strides = [1, 1]} : vector<8x16xf32> to vector<8x8xf32>
    %cst_32 = arith.constant 0.000000e+00 : f32
    %68 = vector.broadcast %cst_32 : f32 to vector<8x8xf32>
    %69 = arith.subf %68, %67 : vector<8x8xf32>
    %70 = vector.extract_strided_slice %66 {offsets = [0, 0], sizes = [8, 8], strides = [1, 1]} : vector<8x16xf32> to vector<8x8xf32>
    %71 = tpu.concatenate %69, %70 in 1 : vector<8x8xf32>, vector<8x8xf32> -> vector<8x16xf32>
    %72 = arith.mulf %66, %49 : vector<8x16xf32>
    %73 = arith.mulf %71, %50 : vector<8x16xf32>
    %74 = arith.addf %72, %73 : vector<8x16xf32>
    %75 = vector.extract_strided_slice %48 {offsets = [0, 0], sizes = [8, 32], strides = [1, 1]} : vector<8x128xf32> to vector<8x32xf32>
    %76 = vector.extract_strided_slice %48 {offsets = [0, 32], sizes = [8, 32], strides = [1, 1]} : vector<8x128xf32> to vector<8x32xf32>
    %cst_33 = arith.constant dense<0.000000e+00> : vector<8x8xf32>
    %77 = tpu.matmul %65, %75, %cst_33 {dimension_numbers = #tpu.dot_dimension_numbers<[1], [1], [0], [0], [0, 0, 1, 0], [], []>} : vector<8x32xf32>, vector<8x32xf32>, vector<8x8xf32> -> vector<8x8xf32>
    %cst_34 = arith.constant dense<0.000000e+00> : vector<8x8xf32>
    %78 = tpu.matmul %74, %58, %cst_34 {dimension_numbers = #tpu.dot_dimension_numbers<[1], [1], [0], [0], [0, 0, 1, 0], [], []>} : vector<8x16xf32>, vector<8x16xf32>, vector<8x8xf32> -> vector<8x8xf32>
    %79 = arith.addf %77, %78 : vector<8x8xf32>
    %cst_35 = arith.constant 0.144337565 : f32
    %80 = vector.broadcast %cst_35 : f32 to vector<8x8xf32>
    %81 = arith.mulf %79, %80 : vector<8x8xf32>
    %cst_36 = arith.constant -1.000000e+30 : f32
    %82 = vector.broadcast %cst_36 : f32 to vector<8x8xf32>
    %83 = arith.select %61, %81, %82 : vector<8x8xi1>, vector<8x8xf32>
    %cst_37 = arith.constant dense<0xFF800000> : vector<8xf32>
    %84 = vector.multi_reduction <maximumf>, %83, %cst_37 [1] : vector<8x8xf32> to vector<8xf32>
    %85 = vector.shape_cast %84 : vector<8xf32> to vector<8x1xf32>
    %86 = vector.broadcast %85 : vector<8x1xf32> to vector<8x8xf32>
    %87 = arith.subf %83, %86 : vector<8x8xf32>
    %88 = math.exp %87 : vector<8x8xf32>
    %cst_38 = arith.constant dense<0.000000e+00> : vector<8xf32>
    %89 = vector.multi_reduction <add>, %88, %cst_38 [1] : vector<8x8xf32> to vector<8xf32>
    %90 = vector.shape_cast %89 : vector<8xf32> to vector<8x1xf32>
    %91 = tpu.reciprocal %90 {approx = true} : vector<8x1xf32> -> vector<8x1xf32>
    %92 = vector.broadcast %91 : vector<8x1xf32> to vector<8x8xf32>
    %93 = arith.mulf %88, %92 : vector<8x8xf32>
    %cst_39 = arith.constant dense<0.000000e+00> : vector<8x32xf32>
    %94 = tpu.matmul %93, %76, %cst_39 {dimension_numbers = #tpu.dot_dimension_numbers<[1], [0], [0], [1], [0, 0, 1, 1], [], []>} : vector<8x8xf32>, vector<8x32xf32>, vector<8x32xf32> -> vector<8x32xf32>
    %95 = vector.extract_strided_slice %62 {offsets = [0, 0], sizes = [32, 64], strides = [1, 1]} : vector<64x64xf32> to vector<32x64xf32>
    %cst_40 = arith.constant dense<0.000000e+00> : vector<8x64xf32>
    %96 = tpu.matmul %94, %95, %cst_40 {dimension_numbers = #tpu.dot_dimension_numbers<[1], [0], [0], [1], [0, 0, 1, 1], [], []>} : vector<8x32xf32>, vector<32x64xf32>, vector<8x64xf32> -> vector<8x64xf32>
    %97 = arith.addf %63, %96 : vector<8x64xf32>
    %98 = vector.extract_strided_slice %46 {offsets = [0, 48], sizes = [8, 48], strides = [1, 1]} : vector<8x96xf32> to vector<8x48xf32>
    %99 = vector.extract_strided_slice %98 {offsets = [0, 0], sizes = [8, 32], strides = [1, 1]} : vector<8x48xf32> to vector<8x32xf32>
    %100 = vector.extract_strided_slice %98 {offsets = [0, 32], sizes = [8, 16], strides = [1, 1]} : vector<8x48xf32> to vector<8x16xf32>
    %101 = vector.extract_strided_slice %100 {offsets = [0, 8], sizes = [8, 8], strides = [1, 1]} : vector<8x16xf32> to vector<8x8xf32>
    %cst_41 = arith.constant 0.000000e+00 : f32
    %102 = vector.broadcast %cst_41 : f32 to vector<8x8xf32>
    %103 = arith.subf %102, %101 : vector<8x8xf32>
    %104 = vector.extract_strided_slice %100 {offsets = [0, 0], sizes = [8, 8], strides = [1, 1]} : vector<8x16xf32> to vector<8x8xf32>
    %105 = tpu.concatenate %103, %104 in 1 : vector<8x8xf32>, vector<8x8xf32> -> vector<8x16xf32>
    %106 = arith.mulf %100, %49 : vector<8x16xf32>
    %107 = arith.mulf %105, %50 : vector<8x16xf32>
    %108 = arith.addf %106, %107 : vector<8x16xf32>
    %109 = vector.extract_strided_slice %48 {offsets = [0, 64], sizes = [8, 32], strides = [1, 1]} : vector<8x128xf32> to vector<8x32xf32>
    %110 = vector.extract_strided_slice %48 {offsets = [0, 96], sizes = [8, 32], strides = [1, 1]} : vector<8x128xf32> to vector<8x32xf32>
    %cst_42 = arith.constant dense<0.000000e+00> : vector<8x8xf32>
    %111 = tpu.matmul %99, %109, %cst_42 {dimension_numbers = #tpu.dot_dimension_numbers<[1], [1], [0], [0], [0, 0, 1, 0], [], []>} : vector<8x32xf32>, vector<8x32xf32>, vector<8x8xf32> -> vector<8x8xf32>
    %cst_43 = arith.constant dense<0.000000e+00> : vector<8x8xf32>
    %112 = tpu.matmul %108, %58, %cst_43 {dimension_numbers = #tpu.dot_dimension_numbers<[1], [1], [0], [0], [0, 0, 1, 0], [], []>} : vector<8x16xf32>, vector<8x16xf32>, vector<8x8xf32> -> vector<8x8xf32>
    %113 = arith.addf %111, %112 : vector<8x8xf32>
    %cst_44 = arith.constant 0.144337565 : f32
    %114 = vector.broadcast %cst_44 : f32 to vector<8x8xf32>
    %115 = arith.mulf %113, %114 : vector<8x8xf32>
    %cst_45 = arith.constant -1.000000e+30 : f32
    %116 = vector.broadcast %cst_45 : f32 to vector<8x8xf32>
    %117 = arith.select %61, %115, %116 : vector<8x8xi1>, vector<8x8xf32>
    %cst_46 = arith.constant dense<0xFF800000> : vector<8xf32>
    %118 = vector.multi_reduction <maximumf>, %117, %cst_46 [1] : vector<8x8xf32> to vector<8xf32>
    %119 = vector.shape_cast %118 : vector<8xf32> to vector<8x1xf32>
    %120 = vector.broadcast %119 : vector<8x1xf32> to vector<8x8xf32>
    %121 = arith.subf %117, %120 : vector<8x8xf32>
    %122 = math.exp %121 : vector<8x8xf32>
    %cst_47 = arith.constant dense<0.000000e+00> : vector<8xf32>
    %123 = vector.multi_reduction <add>, %122, %cst_47 [1] : vector<8x8xf32> to vector<8xf32>
    %124 = vector.shape_cast %123 : vector<8xf32> to vector<8x1xf32>
    %125 = tpu.reciprocal %124 {approx = true} : vector<8x1xf32> -> vector<8x1xf32>
    %126 = vector.broadcast %125 : vector<8x1xf32> to vector<8x8xf32>
    %127 = arith.mulf %122, %126 : vector<8x8xf32>
    %cst_48 = arith.constant dense<0.000000e+00> : vector<8x32xf32>
    %128 = tpu.matmul %127, %110, %cst_48 {dimension_numbers = #tpu.dot_dimension_numbers<[1], [0], [0], [1], [0, 0, 1, 1], [], []>} : vector<8x8xf32>, vector<8x32xf32>, vector<8x32xf32> -> vector<8x32xf32>
    %129 = vector.extract_strided_slice %62 {offsets = [32, 0], sizes = [32, 64], strides = [1, 1]} : vector<64x64xf32> to vector<32x64xf32>
    %cst_49 = arith.constant dense<0.000000e+00> : vector<8x64xf32>
    %130 = tpu.matmul %128, %129, %cst_49 {dimension_numbers = #tpu.dot_dimension_numbers<[1], [0], [0], [1], [0, 0, 1, 1], [], []>} : vector<8x32xf32>, vector<32x64xf32>, vector<8x64xf32> -> vector<8x64xf32>
    %131 = arith.addf %97, %130 : vector<8x64xf32>
    %132 = arith.addf %0, %131 : vector<8x64xf32>
    %133 = arith.mulf %132, %132 : vector<8x64xf32>
    %cst_50 = arith.constant dense<0.000000e+00> : vector<8xf32>
    %134 = vector.multi_reduction <add>, %133, %cst_50 [1] : vector<8x64xf32> to vector<8xf32>
    %135 = vector.shape_cast %134 : vector<8xf32> to vector<8x1xf32>
    %cst_51 = arith.constant 6.400000e+01 : f32
    %136 = vector.broadcast %cst_51 : f32 to vector<8x1xf32>
    %137 = arith.divf %135, %136 : vector<8x1xf32>
    %c0_52 = arith.constant 0 : index
    %c0_53 = arith.constant 0 : index
    %138 = vector.load %arg9[%c0_52, %c0_53] : memref<1x64xf32, #tpu.memory_space<vmem>>, vector<1x64xf32>
    %cst_54 = arith.constant 9.99999997E-7 : f32
    %139 = vector.broadcast %cst_54 : f32 to vector<8x1xf32>
    %140 = arith.addf %137, %139 : vector<8x1xf32>
    %141 = math.rsqrt %140 : vector<8x1xf32>
    %142 = vector.broadcast %141 : vector<8x1xf32> to vector<8x64xf32>
    %143 = arith.mulf %132, %142 : vector<8x64xf32>
    %144 = vector.broadcast %138 : vector<1x64xf32> to vector<8x64xf32>
    %145 = arith.mulf %144, %143 : vector<8x64xf32>
    %c0_55 = arith.constant 0 : index
    %c0_56 = arith.constant 0 : index
    %146 = vector.load %arg10[%c0_55, %c0_56] : memref<64x256xf32, #tpu.memory_space<vmem>>, vector<64x256xf32>
    %cst_57 = arith.constant dense<0.000000e+00> : vector<8x256xf32>
    %147 = tpu.matmul %145, %146, %cst_57 {dimension_numbers = #tpu.dot_dimension_numbers<[1], [0], [0], [1], [0, 0, 1, 1], [], []>} : vector<8x64xf32>, vector<64x256xf32>, vector<8x256xf32> -> vector<8x256xf32>
    %148 = vector.extract_strided_slice %147 {offsets = [0, 0], sizes = [8, 128], strides = [1, 1]} : vector<8x256xf32> to vector<8x128xf32>
    %149 = vector.extract_strided_slice %147 {offsets = [0, 128], sizes = [8, 128], strides = [1, 1]} : vector<8x256xf32> to vector<8x128xf32>
    %150 = arith.negf %148 : vector<8x128xf32>
    %151 = math.exp %150 : vector<8x128xf32>
    %cst_58 = arith.constant 1.000000e+00 : f32
    %152 = vector.broadcast %cst_58 : f32 to vector<8x128xf32>
    %153 = arith.addf %152, %151 : vector<8x128xf32>
    %154 = arith.divf %152, %153 : vector<8x128xf32>
    %155 = arith.mulf %148, %154 : vector<8x128xf32>
    %156 = arith.mulf %155, %149 : vector<8x128xf32>
    %c0_59 = arith.constant 0 : index
    %c0_60 = arith.constant 0 : index
    %157 = vector.load %arg11[%c0_59, %c0_60] : memref<128x64xf32, #tpu.memory_space<vmem>>, vector<128x64xf32>
    %cst_61 = arith.constant dense<0.000000e+00> : vector<8x64xf32>
    %158 = tpu.matmul %156, %157, %cst_61 {dimension_numbers = #tpu.dot_dimension_numbers<[1], [0], [0], [1], [0, 0, 1, 1], [], []>} : vector<8x128xf32>, vector<128x64xf32>, vector<8x64xf32> -> vector<8x64xf32>
    %159 = arith.addf %132, %158 : vector<8x64xf32>
    %c0_62 = arith.constant 0 : index
    %c0_63 = arith.constant 0 : index
    %160 = vector.load %arg14[%c0_62, %c0_63] : memref<8x64xf32, #tpu.memory_space<vmem>>, vector<8x64xf32>
    tpu.vector_store %arg14[%c0_62, %c0_63], %159 {strides = array<i32>} : memref<8x64xf32, #tpu.memory_space<vmem>>, vector<8x64xf32>,
    return
  }
  func.func @transform_0(%arg0: i32) -> (i32, i32) {
    %c0_i32 = arith.constant 0 : i32
    %c0_i32_0 = arith.constant 0 : i32
    return %arg0, %c0_i32 : i32, i32
  }
  func.func @transform_1(%arg0: i32) -> (i32, i32) {
    %c0_i32 = arith.constant 0 : i32
    %c0_i32_0 = arith.constant 0 : i32
    %c0_i32_1 = arith.constant 0 : i32
    return %c0_i32, %c0_i32_0 : i32, i32
  }
  func.func @transform_2(%arg0: i32) -> (i32, i32) {
    %c0_i32 = arith.constant 0 : i32
    %c0_i32_0 = arith.constant 0 : i32
    %c0_i32_1 = arith.constant 0 : i32
    return %c0_i32, %c0_i32_0 : i32, i32
  }
  func.func @transform_3(%arg0: i32) -> (i32, i32) {
    %c0_i32 = arith.constant 0 : i32
    %c0_i32_0 = arith.constant 0 : i32
    %c0_i32_1 = arith.constant 0 : i32
    return %c0_i32, %c0_i32_0 : i32, i32
  }
  func.func @transform_4(%arg0: i32) -> (i32, i32) {
    %c0_i32 = arith.constant 0 : i32
    %c0_i32_0 = arith.constant 0 : i32
    %c0_i32_1 = arith.constant 0 : i32
    return %c0_i32, %c0_i32_0 : i32, i32
  }
  func.func @transform_5(%arg0: i32) -> (i32, i32) {
    %c0_i32 = arith.constant 0 : i32
    %c0_i32_0 = arith.constant 0 : i32
    %c0_i32_1 = arith.constant 0 : i32
    return %c0_i32, %c0_i32_0 : i32, i32
  }
  func.func @transform_6(%arg0: i32) -> (i32, i32) {
    %c0_i32 = arith.constant 0 : i32
    %c0_i32_0 = arith.constant 0 : i32
    %c0_i32_1 = arith.constant 0 : i32
    return %c0_i32, %c0_i32_0 : i32, i32
  }
  func.func @transform_7(%arg0: i32) -> (i32, i32) {
    %c0_i32 = arith.constant 0 : i32
    %c0_i32_0 = arith.constant 0 : i32
    %c0_i32_1 = arith.constant 0 : i32
    return %c0_i32, %c0_i32_0 : i32, i32
  }
  func.func @transform_8(%arg0: i32) -> (i32, i32) {
    %c0_i32 = arith.constant 0 : i32
    %c0_i32_0 = arith.constant 0 : i32
    %c0_i32_1 = arith.constant 0 : i32
    return %c0_i32, %c0_i32_0 : i32, i32
  }
  func.func @transform_9(%arg0: i32) -> (i32, i32) {
    %c0_i32 = arith.constant 0 : i32
    %c0_i32_0 = arith.constant 0 : i32
    %c0_i32_1 = arith.constant 0 : i32
    return %c0_i32, %c0_i32_0 : i32, i32
  }
  func.func @transform_10(%arg0: i32) -> (i32, i32) {
    %c0_i32 = arith.constant 0 : i32
    %c0_i32_0 = arith.constant 0 : i32
    %c0_i32_1 = arith.constant 0 : i32
    return %c0_i32, %c0_i32_0 : i32, i32
  }
  func.func @transform_11(%arg0: i32) -> (i32, i32) {
    %c0_i32 = arith.constant 0 : i32
    %c0_i32_0 = arith.constant 0 : i32
    %c0_i32_1 = arith.constant 0 : i32
    return %c0_i32, %c0_i32_0 : i32, i32
  }
  func.func @transform_12(%arg0: i32) -> (i32, i32) {
    %c0_i32 = arith.constant 0 : i32
    %c0_i32_0 = arith.constant 0 : i32
    %c0_i32_1 = arith.constant 0 : i32
    return %c0_i32, %c0_i32_0 : i32, i32
  }
  func.func @transform_13(%arg0: i32) -> (i32, i32) {
    %c0_i32 = arith.constant 0 : i32
    %c0_i32_0 = arith.constant 0 : i32
    return %arg0, %c0_i32 : i32, i32
  }
}

</mosaic_0001>

<bundles_post_ra>
// kernel: tpu_custom_call.1
= control target key start
LH: loop header
LB: loop body
LE: loop exit
PB: predicated region body
PF: predicated region fallthrough
CT: control target
= control target key end

     0   :  { %s3313_s0 = inlined_call_operand.hbm [shape: f32[16,64], index: 0, kind: input, shape index: {}]   ;;  %s3314_s1 = inlined_call_operand.vmem [shape: f32[1,64], index: 1, kind: input, shape index: {}]   ;;  %s3315_s2 = inlined_call_operand.vmem [shape: f32[64,80], index: 2, kind: input, shape index: {}]   ;;  %s3316_s3 = inlined_call_operand.hbm [shape: f32[1,32], index: 3, kind: input, shape index: {}]   ;;  %s3317_s4 = inlined_call_operand.vmem [shape: f32[32,96], index: 4, kind: input, shape index: {}]   ;;  %s3318_s5 = inlined_call_operand.hbm [shape: f32[1,32], index: 5, kind: input, shape index: {}]   ;;  %s3319_s6 = inlined_call_operand.hbm [shape: f32[32,128], index: 6, kind: input, shape index: {}]   ;;  %s3320_s7 = inlined_call_operand.hbm [shape: f32[64,64], index: 7, kind: input, shape index: {}]   ;;  %s3321_s8 = inlined_call_operand.hbm [shape: f32[1,64], index: 8, kind: input, shape index: {}]   ;;  %s3322_s9 = inlined_call_operand.vmem [shape: f32[64,256], index: 9, kind: input, shape index: {}]   ;;  %s3323_s10 = inlined_call_operand.vmem [shape: f32[128,64], index: 10, kind: input, shape index: {}]   ;;  %s3324_s11 = inlined_call_operand.vmem [shape: f32[8,16], index: 11, kind: input, shape index: {}]   ;;  %s3325_s12 = inlined_call_operand.hbm [shape: f32[8,16], index: 12, kind: input, shape index: {}]   ;;  %s3326_s13 = inlined_call_operand.hbm [shape: f32[16,64], index: 13, kind: output, shape index: {}]  }
   0x1   :  { %3335 = sst [smem:[#allocation20_spill]] %s3316_s3 }
   0x2   :  { %3336 = sst [smem:[#allocation21_spill]] %s3318_s5 }
   0x3   :  { %3337 = sst [smem:[#allocation22_spill]] %s3319_s6 }
   0x4   :  { %3338 = sst [smem:[#allocation23_spill]] %s3322_s9 }
   0x5   :  { %3339 = sst [smem:[#allocation24_spill]] %s3323_s10 }
   0x6   :  { %3340 = sst [smem:[#allocation25_spill]] %s3326_s13 }
   0x7   :  { %18 = vsyncpa [#allocation3], 0 }
   0x8   :  { %20 = vsyncpa [#allocation3 + $0x1], 0 }
   0x9   :  { %21 = vsyncpa [#allocation6], 0 }
   0xa   :  { %22 = vsyncpa [#allocation9], 0 }
   0xb   :  { %23 = vsyncpa [#allocation12], 0 }
   0xc   :  { %24 = vsyncpa [#allocation4], 0 }
   0xd   :  { %26 = vsyncpa [#allocation4 + $0x1], 0  ;;  %s2705_s25 = smov 0   ;;  %s2707_s26 = smov 0  }
   0xe   :  { %s2709_s27 = smov 0   ;;  %s2711_s28 = smov 0  }
   0xf LB: > { %s2612_s29 = smov [#allocation5]   ;;  %s2726_s14 = sadd.s32 4294967295, %s2610_s28   ;;  %s2610_s28 = sphi %s2711_s28, %s3371_s28   ;;  %s2606_s27 = sphi %s2709_s27, %s3370_s27   ;;  %s2602_s26 = sphi %s2707_s26, %s3369_s26   ;;  %s2598_s25 = sphi %s2705_s25, %s3368_s25  }
  0x10   : > { %s360_s30 = sshll.u32 %s2612_s29, 4  ;;  %p1882_p0 = scmp.ge.s32.totalorder %s2610_s28, 1  ;;  %s2731_s30 = int_to_ptr.vmem [resolvable:$true] %s360_s30 }
  0x11   : > { %p3332_p1 = scmp.eq.s32.totalorder %s2726_s14, 0  ;;  %p341_p2 = scmp.lt.s32.totalorder %s2610_s28, 3 }
  0x12   : > { %s2613_s16 = smov [#allocation8]   ;;  %s2614_s19 = smov [#allocation11]  }
  0x13   : > { %p2733_p3 = pnand %p1882_p0, %p341_p2  ;;  %s384_s17 = sshll.u32 %s2613_s16, 4  ;;  %s2740_s17 = int_to_ptr.vmem [resolvable:$true] %s384_s17 }
  0x14   : > { %s411_s20 = sshll.u32 %s2614_s19, 4  ;;  %s3343_s3 = sld [smem:[#allocation20_spill]]  ;;  %s2748_s20 = int_to_ptr.vmem [resolvable:$true] %s411_s20 }
  0x15   : > { %s3341_s15 = scalar_select %p2733_p3, 1, 0 }
  0x16   : > { %p2220_p5 = pneg %p2733_p3 }
  0x18   : > { %p2744_p6 = pnand %p2220_p5, %p3332_p1 }
  0x1a   : > { %s2334_s23 = scalar_lea.hbm %s3343_s3, 16  ;;  %p2758_p8 = pneg %p2744_p6 }
  0x1b   : > { %p2335_p7 = scmp.ne.s32.totalorder %s3343_s3, %s2334_s23  ;;  %p2341_p11 = scmp.lt.u32.totalorder %s2334_s23, %s3343_s3 }
  0x1d   : > { %p2337_p9 = pnand %p2758_p8, %p2335_p7 }
  0x1f   : > { %p2338_p10 = pneg %p2337_p9 }
  0x21   : > { %p2343_p12 = pnand %p2341_p11, %p2338_p10 }
  0x23   : > { %2346 = shalt.err (!%p2343_p12)
}
  0x24   : > { %s2347_s21 = scalar_lea.vmem %s2731_s30, 16  ;;  %s2354_s22 = scalar_lea.vmem %s2731_s30, 32 }
  0x25   : > { %p2348_p13 = scmp.ne.s32.totalorder %s2731_s30, %s2347_s21  ;;  %p2355_p5 = scmp.lt.s32.totalorder %s2731_s30, %s2731_s30 }
  0x26   : > { %p2356_p7 = scmp.lt.s32.totalorder %s2354_s22, %s2347_s21 }
  0x27   : > { %p2350_p0 = pnand %p2348_p13, %p2758_p8 }
  0x28   : > { %p2357_p9 = por %p2356_p7, %p2355_p5 }
  0x29   : > { %p2351_p2 = pneg %p2350_p0 }
  0x2b   : > { %p2358_p4 = pnand %p2357_p9, %p2351_p2 }
  0x2d   : > { %2361 = shalt.err (!%p2358_p4)
}
  0x2e   : > { %2223 = dma.hbm_to_vmem [thread:$0]  (!%p2744_p6), %s3343_s3, 16, %s2731_s30, [#allocation6]  }
  0x2f   : > { %s3345_s6 = sld [smem:[#allocation22_spill]] }
  0x35   : > { %s2362_s19 = scalar_lea.hbm %s3345_s6, 512 }
  0x36   : > { %p2363_p10 = scmp.ne.s32.totalorder %s3345_s6, %s2362_s19  ;;  %p2369_p4 = scmp.lt.u32.totalorder %s2362_s19, %s3345_s6 }
  0x38   : > { %p2365_p11 = pnand %p2363_p10, %p2758_p8 }
  0x3a   : > { %p2366_p12 = pneg %p2365_p11 }
  0x3c   : > { %p2371_p13 = pnand %p2369_p4, %p2366_p12 }
  0x3e   : > { %2374 = shalt.err (!%p2371_p13)
}
  0x3f   : > { %s2375_s30 = scalar_lea.vmem %s2740_s17, 512  ;;  %p2383_p7 = scmp.lt.s32.totalorder %s2740_s17, %s2740_s17 }
  0x40   : > { %p2376_p0 = scmp.ne.s32.totalorder %s2740_s17, %s2375_s30  ;;  %p2384_p9 = scmp.lt.s32.totalorder %s2375_s30, %s2375_s30 }
  0x42   : > { %p2378_p2 = pnand %p2376_p0, %p2758_p8  ;;  %p2385_p10 = por %p2384_p9, %p2383_p7 }
  0x44   : > { %p2379_p5 = pneg %p2378_p2 }
  0x46   : > { %p2386_p11 = pnand %p2385_p10, %p2379_p5 }
  0x48   : > { %2389 = shalt.err (!%p2386_p11)
}
  0x49   : > { %s3330_s9 = smov 128   ;;  %s3331_s10 = smov 8  }
  0x4a   : > { %2229 = dma.hbm_to_vmem [thread:$0]  (!%p2744_p6), %s3345_s6, 512, %s2740_s17, [#allocation9], %s3330_s9, %s3330_s9, %s3331_s10  }
  0x4b   : > { %s2390_s19 = scalar_lea.hbm %s3321_s8, 16 }
  0x4c   : > { %p2391_p12 = scmp.ne.s32.totalorder %s3321_s8, %s2390_s19  ;;  %p2397_p0 = scmp.lt.u32.totalorder %s2390_s19, %s3321_s8 }
  0x4e   : > { %p2393_p4 = pnand %p2391_p12, %p2758_p8 }
  0x50   : > { %p2394_p13 = pneg %p2393_p4 }
  0x52   : > { %p2399_p2 = pnand %p2397_p0, %p2394_p13 }
  0x54   : > { %2402 = shalt.err (!%p2399_p2)
}
  0x55   : > { %s2403_s17 = scalar_lea.vmem %s2748_s20, 16  ;;  %s2410_s13 = scalar_lea.vmem %s2748_s20, 32 }
  0x56   : > { %p2404_p5 = scmp.ne.s32.totalorder %s2748_s20, %s2403_s17  ;;  %p2411_p10 = scmp.lt.s32.totalorder %s2748_s20, %s2748_s20 }
  0x57   : > { %p2412_p11 = scmp.lt.s32.totalorder %s2410_s13, %s2403_s17 }
  0x58   : > { %p2406_p7 = pnand %p2404_p5, %p2758_p8 }
  0x59   : > { %p2413_p12 = por %p2412_p11, %p2411_p10 }
  0x5a   : > { %p2407_p9 = pneg %p2406_p7 }
  0x5c   : > { %p2414_p4 = pnand %p2413_p12, %p2407_p9 }
  0x5e   : > { %2417 = shalt.err (!%p2414_p4)
}
  0x5f   : > { %2235 = dma.hbm_to_vmem [thread:$0]  (!%p2744_p6), %s3321_s8, 16, %s2748_s20, [#allocation12]  }
  0x60   : > { %s2617_s24 = smov [#allocation7]   ;;  %s2618_s19 = smov [#allocation10]  }
  0x61   : > { %s374_s29 = sshll.u32 %s2617_s24, 4  ;;  %s397_s21 = sshll.u32 %s2618_s19, 4  ;;  %s375_s29 = int_to_ptr.vmem [resolvable:$true] %s374_s29  ;;  %s398_s21 = int_to_ptr.vmem [resolvable:$true] %s397_s21 }
  0x62   : > { %s3346_s5 = sld [smem:[#allocation21_spill]] }
  0x68   : > { %s2418_s17 = scalar_lea.hbm %s3346_s5, 16 }
  0x69   : > { %p2419_p13 = scmp.ne.s32.totalorder %s3346_s5, %s2418_s17  ;;  %p2425_p5 = scmp.lt.u32.totalorder %s2418_s17, %s3346_s5 }
  0x6b   : > { %p2421_p0 = pnand %p2419_p13, %p2758_p8 }
  0x6d   : > { %p2422_p2 = pneg %p2421_p0 }
  0x6f   : > { %p2427_p7 = pnand %p2425_p5, %p2422_p2 }
  0x71   : > { %2430 = shalt.err (!%p2427_p7)
}
  0x72   : > { %s2431_s20 = scalar_lea.vmem %s375_s29, 16  ;;  %s2438_s23 = scalar_lea.vmem %s375_s29, 32 }
  0x73   : > { %p2432_p9 = scmp.ne.s32.totalorder %s375_s29, %s2431_s20  ;;  %p2439_p12 = scmp.lt.s32.totalorder %s375_s29, %s375_s29 }
  0x74   : > { %p2440_p4 = scmp.lt.s32.totalorder %s2438_s23, %s2431_s20 }
  0x75   : > { %p2434_p10 = pnand %p2432_p9, %p2758_p8 }
  0x76   : > { %p2441_p1 = por %p2440_p4, %p2439_p12 }
  0x77   : > { %p2435_p11 = pneg %p2434_p10 }
  0x79   : > { %p2442_p3 = pnand %p2441_p1, %p2435_p11 }
  0x7b   : > { %2445 = shalt.err (!%p2442_p3)
}
  0x7c   : > { %2226 = dma.hbm_to_vmem [thread:$0]  (!%p2744_p6), %s3346_s5, 16, %s375_s29, [#allocation6]  }
  0x7d   : > { %s2446_s22 = scalar_lea.hbm %s3320_s7, 1024 }
  0x7e   : > { %p2447_p13 = scmp.ne.s32.totalorder %s3320_s7, %s2446_s22  ;;  %p2453_p3 = scmp.lt.u32.totalorder %s2446_s22, %s3320_s7 }
  0x80   : > { %p2449_p0 = pnand %p2447_p13, %p2758_p8 }
  0x82   : > { %p2450_p1 = pneg %p2449_p0 }
  0x84   : > { %p2455_p2 = pnand %p2453_p3, %p2450_p1 }
  0x86   : > { %2458 = shalt.err (!%p2455_p2)
}
  0x87   : > { %s2459_s20 = scalar_lea.vmem %s398_s21, 1024  ;;  %p2467_p10 = scmp.lt.s32.totalorder %s398_s21, %s398_s21 }
  0x88   : > { %p2460_p5 = scmp.ne.s32.totalorder %s398_s21, %s2459_s20  ;;  %p2468_p11 = scmp.lt.s32.totalorder %s2459_s20, %s2459_s20 }
  0x8a   : > { %p2462_p7 = pnand %p2460_p5, %p2758_p8  ;;  %p2469_p12 = por %p2468_p11, %p2467_p10 }
  0x8c   : > { %p2463_p9 = pneg %p2462_p7 }
  0x8e   : > { %p2470_p4 = pnand %p2469_p12, %p2463_p9 }
  0x90   : > { %2473 = shalt.err (!%p2470_p4)
}
  0x91   : > { %s3347_s29 = smov 8   ;;  %s3348_s23 = smov 128  }
  0x92   : > { %2232 = dma.hbm_to_vmem [thread:$0]  (!%p2744_p6), %s3320_s7, 1024, %s398_s21, [#allocation9], %s3348_s23, %s3348_s23, %s3347_s29  }
  0x93   : > { %s2619_s10 = smov [#allocation13]   ;;  %s2474_s17 = scalar_lea.hbm %s3325_s12, 128 }
  0x94   : > { %s431_s19 = sshll.u32 %s2619_s10, 4  ;;  %p2475_p13 = scmp.ne.s32.totalorder %s3325_s12, %s2474_s17  ;;  %s432_s19 = int_to_ptr.vmem [resolvable:$true] %s431_s19 }
  0x95   : > { %p2481_p3 = scmp.lt.u32.totalorder %s2474_s17, %s3325_s12 }
  0x96   : > { %p2477_p0 = pnand %p2475_p13, %p2758_p8 }
  0x98   : > { %p2478_p1 = pneg %p2477_p0 }
  0x9a   : > { %p2483_p2 = pnand %p2481_p3, %p2478_p1 }
  0x9c   : > { %2486 = shalt.err (!%p2483_p2)
}
  0x9d   : > { %s2487_s21 = scalar_lea.vmem %s432_s19, 128  ;;  %p2495_p10 = scmp.lt.s32.totalorder %s432_s19, %s432_s19 }
  0x9e   : > { %p2488_p5 = scmp.ne.s32.totalorder %s432_s19, %s2487_s21  ;;  %p2496_p11 = scmp.lt.s32.totalorder %s2487_s21, %s2487_s21 }
  0xa0   : > { %p2490_p7 = pnand %p2488_p5, %p2758_p8  ;;  %p2497_p12 = por %p2496_p11, %p2495_p10 }
  0xa2   : > { %p2491_p9 = pneg %p2490_p7 }
  0xa4   : > { %p2498_p4 = pnand %p2497_p12, %p2491_p9 }
  0xa6   : > { %2501 = shalt.err (!%p2498_p4)
}
  0xa7   : > { %2238 = dma.hbm_to_vmem [thread:$0]  (!%p2744_p6), %s3325_s12, 128, %s432_s19, [#allocation12]  }
  0xa8   : > { %s1881_s5 = sadd.s32 4294967294, %s2610_s28   ;;  %s2889_s18 = sadd.s32 1, %s2610_s28  }
  0xa9   : > { %s36_s16 = ssub.s32 %s2610_s28, %s2889_s18  ;;  %s39_s9 = sadd.s32 1, %s2606_s27 }
  0xaa   : > { %p37_p8 = scmp.eq.s32.totalorder %s36_s16, 0  ;;  %p46_p13 = scmp.ne.s32.totalorder %s2606_s27, %s2602_s26 }
  0xab   : > { %p47_p0 = scmp.eq.s32.totalorder %s2610_s28, 0  ;;  %p52_p1 = scmp.ne.s32.totalorder %s2602_s26, %s2598_s25 }
  0xac   : > { %s2900_s24 = scalar_select %p37_p8, %s2606_s27, %s39_s9  }
  0xad   : > { %p2902_p3 = por %p47_p0, %p46_p13  ;;  %p3350_p2 = scmp.eq.s32.totalorder %s2726_s14, 0 }
  0xae   : > { %p328_p5 = scmp.eq.s32.totalorder %s2726_s14, 1  ;;  %p334_p7 = scmp.eq.s32.totalorder %s1881_s5, 1 }
  0xaf   : > { %p2908_p6 = por %p3350_p2, %p52_p1  ;;  %p2253_p9 = scmp.lt.s32.totalorder %s2610_s28, 2 }
  0xb0   : > { %s442_s22 = sand.u32 1, %s2606_s27   ;;  %p2915_p10 = por %p328_p5, %p46_p13 }
  0xb1   : > { %p2919_p11 = por %p334_p7, %p52_p1  ;;  %s1890_s13 = sshll.u32 %s442_s22, 3 }
  0xb2   : > { %s3352_s30 = scalar_select %p2915_p10, 1, 0 }
  0xb3   : > { %s3353_s17 = scalar_select %p2919_p11, 1, 0 }
  0xb4   : > { %s1891_s3 = sshll.u32 %s2610_s28, 7  ;;  %s446_s23 = scalar_lea.vmem [#allocation2], %s1890_s13 }
  0xb5   : > { %s2927_s29 = scalar_lea.hbm %s3313_s0, %s1891_s3  ;;  %s453_s5 = sshll.u32 %s446_s23, 4  ;;  %s2929_s5 = int_to_ptr.vmem [resolvable:$true] %s453_s5 }
  0xb6   : > { %p2933_p12 = pnand %p2253_p9, %p2902_p3  ;;  %s443_s9 = scalar_lea.sflag [#allocation3], %s442_s22 }
  0xb7   : > { %s2502_s6 = scalar_lea.hbm %s2927_s29, 128  ;;  %s2507_s20 = scalar_lea.hbm %s3313_s0, 256 }
  0xb8   : > { %p2503_p4 = scmp.ne.s32.totalorder %s2927_s29, %s2502_s6  ;;  %p2504_p8 = pneg %p2933_p12 }
  0xb9   : > { %p2508_p1 = scmp.lt.u32.totalorder %s2927_s29, %s3313_s0  ;;  %p2509_p3 = scmp.lt.u32.totalorder %s2507_s20, %s2502_s6 }
  0xba   : > { %p2505_p13 = pnand %p2504_p8, %p2503_p4  ;;  %p2511_p5 = scmp.lt.u32.totalorder %s2502_s6, %s2927_s29 }
  0xbb   : > { %p2510_p2 = por %p2509_p3, %p2508_p1 }
  0xbc   : > { %p2506_p0 = pneg %p2505_p13 }
  0xbd   : > { %p2512_p7 = por %p2511_p5, %p2510_p2 }
  0xbf   : > { %p2513_p9 = pnand %p2512_p7, %p2506_p0 }
  0xc1   : > { %2516 = shalt.err (!%p2513_p9)
}
  0xc2   : > { %s2517_s22 = scalar_lea.vmem %s2929_s5, 128  ;;  %s2620_s23 = smov [#allocation2]  }
  0xc3   : > { %p2518_p4 = scmp.ne.s32.totalorder %s2929_s5, %s2517_s22  ;;  %s2522_s13 = sshll.u32 %s2620_s23, 4  ;;  %s2523_s13 = int_to_ptr.vmem [resolvable:$false] %s2522_s13 }
  0xc4   : > { %s2524_s3 = scalar_lea.vmem %s2523_s13, 256  ;;  %p2525_p10 = scmp.lt.s32.totalorder %s2929_s5, %s2523_s13 }
  0xc5   : > { %p2520_p13 = pnand %p2518_p4, %p2504_p8  ;;  %p2526_p1 = scmp.lt.s32.totalorder %s2524_s3, %s2517_s22 }
  0xc7   : > { %p2521_p11 = pneg %p2520_p13  ;;  %p2527_p3 = por %p2526_p1, %p2525_p10 }
  0xc9   : > { %p2528_p2 = pnand %p2527_p3, %p2521_p11 }
  0xcb   : > { %2531 = shalt.err (!%p2528_p2)
}
  0xcc   : > { %2242 = dma.hbm_to_vmem [thread:$0]  (!%p2933_p12), %s2927_s29, 128, %s2929_s5, %s443_s9  }
  0xcd   : > { %p3355_p0 = scmp.ne.s32.totalorder %s3341_s15, 0 }
  0xce   : > { %s2965_s6 = sand.u32 (!%p3355_p0), 1, %s2602_s26  }
  0xcf   : > { %462 = sbr.rel (%p3355_p0) target bundleno = 3470 (0xd8e), region = 72  ;;  %s1893_s20 = sshll.u32 (!%p3355_p0), %s2965_s6, 3 }
  0xd0   : > { %s465_s10 = scalar_lea.sflag (!%p3355_p0), [#allocation3], %s2965_s6  ;;  %s468_s21 = scalar_lea.vmem (!%p3355_p0), [#allocation2], %s1893_s20 }
  0xd6   : > { %2577 = dma.done.wait (%p2908_p6), %s465_s10, 128  }
  0xd7   : > { %2579 = vsyncadd (%p2908_p6), %s465_s10, 4294967168  ;;  %p3356_p10 = scmp.eq.s32.totalorder %s2726_s14, 0 }
  0xd9   : > { %2581 = dma.done.wait (%p3356_p10), [#allocation6], 32   ;;  %p3357_p11 = pmov %p3356_p10 }
  0xda   : > { %p3358_p12 = pmov %p3356_p10 }
  0xdb   : > { %2583 = vsyncadd (%p3357_p11), [#allocation6], 4294967264 }
  0xdc   : > { %2585 = dma.done.wait (%p3358_p12), [#allocation9], 1536   ;;  %p3359_p8 = pmov %p3356_p10 }
  0xde   : > { %2587 = vsyncadd (%p3359_p8), [#allocation9], 4294965760  ;;  %p3360_p5 = pmov %p3359_p8 }
  0xe0   : > { %2589 = dma.done.wait (%p3360_p5), [#allocation12], 144   ;;  %p3361_p7 = pmov %p3360_p5 }
  0xe1   : > { %v2987_v0 = vld [vmem:[%s468_s21] sm:$0xff]  ;;  %vm537_vm0 = vcmask 523264   ;;  %v2621_v6 = vmov 0.0|0.0   ;;  %v556_v7 = vld [vmem:[%s3315_s2 + $0x10] sm:$0xff]  ;;  %v557_v8 = vld [vmem:[%s3315_s2 + $0x18] sm:$0xff]  ;;  %vm2622_vm1 = vmmov 0  }
  0xe2   : > { %2591 = vsyncadd (%p3361_p7), [#allocation12], 4294967152  ;;  %v536_v1 = vmul.f32 %v2987_v0, %v2987_v0  ;;  %v554_v3 = vld [vmem:[%s3315_s2] sm:$0xff]  ;;  %v555_v4 = vld [vmem:[%s3315_s2 + $0x8] sm:$0xff]  ;;  %2112 = vmatprep.subr.bf16.mxu0 %v2621_v6  ;;  %2130 = vmatprep.subr.bf16.mxu1 %v2621_v6  ;;  %v2116_v9 = vpack.c.bf16 %v557_v8, %v556_v7  ;;  %v2623_v12 = vmov 0.0   ;;  %vm636_vm2 = vcmask 261120  }
  0xe3   : > { %v2113_v5 = vpack.c.bf16 %v555_v4, %v554_v3  ;;  %v558_v10 = vld [vmem:[%s3315_s2 + $0x20] sm:$0xff]  ;;  %v559_v11 = vld [vmem:[%s3315_s2 + $0x28] sm:$0xff]  ;;  %2000 = vmatprep.mubr.msk.f32.mxu0 %vm2622_vm1, %v2623_v12  ;;  %2022 = vmatprep.mubr.msk.f32.mxu1 %vm2622_vm1, %v2623_v12  ;;  %v560_v14 = vld [vmem:[%s3315_s2 + $0x30] sm:$0xff]  ;;  %s2624_s22 = smov 96   ;;  %s2625_s5 = smov 56   ;;  %vm841_vm3 = vcmask 64512  }
  0xe4   : > { %v538_v2 = vsel %vm537_vm0, %v536_v1, 0.0  ;;  %v2119_v13 = vpack.c.bf16 %v559_v11, %v558_v10  ;;  %v561_v15 = vld [vmem:[%s3315_s2 + $0x38] sm:$0xff]  ;;  %v1901_v21 = vld [vmem:[%s3314_s1] ss:$0 sm:$0xff]  ;;  %v677_v29 = vld [vmem:[%s3317_s4 + $0x8] sm:$0xff]  ;;  %s2626_s16 = smov 72  }
  0xe5   : > { %539 = vadd.xlane.f32.xlu0 %v538_v2  ;;  %2114 = vmatpush3.bf16.msra.mxu0 %v2113_v5  ;;  %v2122_v16 = vpack.c.bf16 %v561_v15, %v560_v14  ;;  %v676_v28 = vld [vmem:[%s3317_s4] sm:$0xff]  ;;  %v678_v31 = vld [vmem:[%s3317_s4 + $0x10] sm:$0xff]  ;;  %v679_v32 = vld [vmem:[%s3317_s4 + $0x18] sm:$0xff]  ;;  %s2627_s9 = smov 104   ;;  %s2628_s23 = smov 88   ;;  %vm893_vm4 = vcmask 130048  }
  0xe6   : > { %2115 = vmatprep.subr.bf16.mxu0 %v2621_v6  ;;  %v2125_v30 = vpack.c.bf16 %v677_v29, %v676_v28  ;;  %v2128_v33 = vpack.c.bf16 %v679_v32, %v678_v31  ;;  %v1903_v40 = vld [vmem:[#allocation5] ss:$0 sm:$0xff]  ;;  %v753_v43 = vld [vmem:[#allocation8] sm:$0xff]  ;;  %v754_v44 = vld [vmem:[#allocation8 + $0x8] sm:$0xff]  ;;  %s2629_s10 = smov 64   ;;  %s2630_s21 = smov 32  }
  0xe7   : > { %v755_v45 = vld [vmem:[#allocation8 + $0x10] sm:$0xff]  ;;  %v2131_v46 = vpack.c.bf16 %v754_v44, %v753_v43  ;;  %v756_v47 = vld [vmem:[#allocation8 + $0x18] sm:$0xff]  ;;  %v831_v63 = vld [vmem:[#allocation13] sm:$0xff]  ;;  %s2631_s15 = smov 40   ;;  %s2632_s19 = smov 80  }
  0xe8   : > { %v2134_v48 = vpack.c.bf16 %v756_v47, %v755_v45  ;;  %v830_v58 = vld [vmem:[%s3324_s11] sm:$0xff]  ;;  %v1904_v59 = vld [vmem:[#allocation7] ss:$0 sm:$0xff]  ;;  %p3365_p9 = scmp.ne.s32.totalorder %s3352_s30, 0 }
  0xe9   : > { %2117 = vmatpush3.bf16.msra.mxu0 %v2116_v9  ;;  %2132 = vmatpush3.bf16.msra.mxu1 %v2131_v46 }
  0xea   : > { %2118 = vmatprep.subr.bf16.mxu0 %v2621_v6  ;;  %2133 = vmatprep.subr.bf16.mxu1 %v2621_v6 }
  0xed   : > { %2120 = vmatpush3.bf16.msra.mxu0 %v2119_v13  ;;  %2135 = vmatpush3.bf16.msra.mxu1 %v2134_v48 }
  0xee   : > { %2121 = vmatprep.subr.bf16.mxu0 %v2621_v6  ;;  %2035 = vmatprep.subr.mxu1 %v2623_v12 }
  0xf1   : > { %2123 = vmatpush3.bf16.msra.mxu0 %v2122_v16 }
  0xf2   : > { %2124 = vmatprep.subr.bf16.mxu0 %v2621_v6 }
 0x172   : > { %v540_v17 = vpop.xlane.xlu0 %539 }
 0x173   : > { %v542_v18 = vmul.f32 0.015625, %v540_v17 }
 0x175   : > { %v544_v19 = vadd.f32 1e-06, %v542_v18 }
 0x177   : > { %2314 = vrsqrt.f32 %v544_v19 }
 0x181   : > { %v2315_v20 = vpop.eup %2314 }
 0x182   : > { %v546_v22 = vmul.f32 %v2315_v20, %v2987_v0 }
 0x184   : > { %v553_v23 = vmul.f32 %v1901_v21, %v546_v22 }
 0x186   : > { %2001 = vmatmul.mubr.msk.f32.vlgmr.msra.gmra.mrb[0].mxu0 %vm537_vm0, %v553_v23 }
 0x187   : > { %2011 = vmatprep.mubr.msk.f32.mxu0 %vm2622_vm1, %v2623_v12  ;;  %2126 = vmatpush3.bf16.msra.mxu0 %v2125_v30 }
 0x188   : > { %2127 = vmatprep.subr.bf16.mxu0 %v2621_v6 }
 0x18b   : > { %2129 = vmatpush3.bf16.msra.mxu0 %v2128_v33 }
 0x18c   : > { %2025 = vmatprep.subr.mxu0 %v2623_v12 }
 0x259   : > { %v3033_v24 = vpop.f32.mrb[0].mxu0 }
 0x25a   : > { %v2002_v25 = vpop.f32.mrb[1].mxu0  ;;  %v635_v26 = vmul.f32 %v3033_v24, %v3033_v24  ;;  %v832_v54 = vsub.f32 0.0, %v3033_v24 }
 0x25c   : > { %654 = vrot.lane.b32.xlu1 %v635_v26, %s2624_s22  ;;  %v637_v27 = vsel %vm636_vm2, %v635_v26, 0.0  ;;  %v854_v26 = vlaneseq }
 0x25d   : > { %638 = vadd.xlane.f32.xlu0 %v637_v27 }
 0x25e   : > { %v3104_v27 = vshrl.u32 %v854_v26, 7  ;;  %v857_v28 = vand.u32 127, %v854_v26 }
 0x260   : > { %vm858_vm5 = vcmp.le.s32.totalorder %v857_v28, %v3104_v27 }
 0x2ce   : > { %v655_v34 = vpop.permute.xlu1 %654 }
 0x2cf   : > { %v657_v35 = vsel %vm636_vm2, %v655_v34, 0.0 }
 0x2d0   : > { %658 = vadd.xlane.f32.xlu1 %v657_v35 }
 0x2ea   : > { %v639_v36 = vpop.xlane.xlu0 %638 }
 0x2eb   : > { %v641_v37 = vmul.f32 0.03125, %v639_v36 }
 0x2ed   : > { %v643_v38 = vadd.f32 1e-06, %v641_v37 }
 0x2ef   : > { %2316 = vrsqrt.f32 %v643_v38 }
 0x2f9   : > { %v2317_v39 = vpop.eup %2316 }
 0x2fa   : > { %v645_v41 = vmul.f32 %v2317_v39, %v3033_v24 }
 0x2fc   : > { %v652_v42 = vmul.f32 %v1903_v40, %v645_v41 }
 0x2fe   : > { %2012 = vmatmul.mubr.msk.f32.vlgmr.msra.gmra.mrb[2].mxu0 %vm636_vm2, %v652_v42 }
 0x2ff   : > { %2027 = vmatprep.mubr.msk.f32.mxu0 %vm2622_vm1, %v2623_v12 }
 0x35d   : > { %v659_v49 = vpop.xlane.xlu1 %658 }
 0x35e   : > { %v660_v50 = vmul.f32 0.03125, %v659_v49  ;;  %v859_v49 = vld [vmem:[#allocation10] sm:$0xff] }
 0x360   : > { %v662_v51 = vadd.f32 1e-06, %v660_v50  ;;  %v860_v50 = vld [vmem:[#allocation10 + $0x8] sm:$0xff] }
 0x362   : > { %2318 = vrsqrt.f32 %v662_v51  ;;  %v2143_v51 = vpack.c.bf16 %v860_v50, %v859_v49 }
 0x36c   : > { %v2319_v52 = vpop.eup %2318 }
 0x36d   : > { %v664_v53 = vmul.f32 %v2319_v52, %v3033_v24  ;;  %v861_v52 = vld [vmem:[#allocation10 + $0x10] sm:$0xff] }
 0x36f   : > { %672 = vrot.lane.b32.xlu0 %v664_v53, %s2624_s22  ;;  %v862_v53 = vld [vmem:[#allocation10 + $0x18] sm:$0xff] }
 0x373   : > { %834 = vrot.lane.b32.xlu0 %v832_v54, %s2625_s5 }
 0x377   : > { %838 = vrot.lane.b32.xlu0 %v3033_v24, %s2626_s16  ;;  %s3362_s16 = sld [smem:[#allocation23_spill]] }
 0x37d   : > { %v1555_v27 = vld [vmem:[%s3362_s16 + $0x8] sm:$0xff] }
 0x3d1   : > { %v3065_v55 = vpop.f32.mrb[2].mxu0 }
 0x3d2   : > { %873 = vrot.lane.b32.xlu1 %v3065_v55, %s2627_s9  ;;  %v2013_v56 = vpop.f32.mrb[3].mxu0  ;;  %v867_v57 = vsub.f32 0.0, %v3065_v55  ;;  %s1923_s9 = sshll.u32 %s2726_s14, 7  ;;  %s1741_s14 = scalar_lea.sflag [#allocation4], %s2965_s6 }
 0x3d4   : > { %869 = vrot.lane.b32.xlu0 %v867_v57, %s2628_s23  ;;  %s534_s23 = scalar_lea.vmem [#allocation14], %s1893_s20  ;;  %s2634_s20 = smov [#allocation14]  }
 0x3d5   : > { %s1754_s13 = sshll.u32 %s534_s23, 4  ;;  %s3270_s13 = int_to_ptr.vmem [resolvable:$true] %s1754_s13 }
 0x3d8   : > { %844 = vrot.lane.b32.xlu0 %v830_v58, %s2629_s10 }
 0x3e1   : > { %v673_v60 = vpop.permute.xlu0 %672 }
 0x3e2   : > { %v675_v61 = vmul.f32 %v1904_v59, %v673_v60 }
 0x3e4   : > { %2023 = vmatmul.mubr.msk.f32.vlgmr.msra.gmra.mrb[0].mxu1 %vm636_vm2, %v675_v61 }
 0x3e5   : > { %v835_v62 = vpop.permute.xlu0 %834  ;;  %2037 = vmatprep.mubr.msk.f32.mxu1 %vm2622_vm1, %v2623_v12 }
 0x3e9   : > { %v839_v1 = vpop.permute.xlu0 %838 }
 0x3ea   : > { %v842_v2 = vsel %vm841_vm3, %v835_v62, %v839_v1 }
 0x3eb   : > { %v848_v3 = vmul.f32 %v842_v2, %v831_v63 }
 0x3ed   : > { %850 = vrot.lane.b32.xlu0 %v848_v3, %s2629_s10 }
 0x3f1   : > { %877 = vrot.lane.b32.xlu0 %v830_v58, %s2630_s21 }
 0x444   : > { %v874_v4 = vpop.permute.xlu1 %873 }
 0x446   : > { %v870_v5 = vpop.permute.xlu0 %869 }
 0x447   : > { %v876_v7 = vsel %vm841_vm3, %v870_v5, %v874_v4 }
 0x448   : > { %v881_v8 = vmul.f32 %v876_v7, %v831_v63 }
 0x44a   : > { %883 = vrot.lane.b32.xlu0 %v881_v8, %s2630_s21  ;;  %v845_v9 = vpop.permute.xlu0 %844 }
 0x44b   : > { %v847_v10 = vmul.f32 %v845_v9, %v3033_v24 }
 0x45f   : > { %v851_v11 = vpop.permute.xlu0 %850 }
 0x460   : > { %v853_v13 = vadd.f32 %v851_v11, %v847_v10  ;;  %v863_v10 = vld [vmem:[#allocation10 + $0x20] sm:$0xff]  ;;  %v864_v11 = vld [vmem:[#allocation10 + $0x28] sm:$0xff] }
 0x462   : > { %891 = vrot.lane.b32.xlu1 %v853_v13, %s2629_s10 }
 0x463   : > { %v878_v15 = vpop.permute.xlu0 %877 }
 0x464   : > { %v880_v17 = vmul.f32 %v878_v15, %v3065_v55  ;;  %v2137_v15 = vpack.c.bf16 %v864_v11, %v863_v10 }
 0x466   : > { %1132 = vrot.lane.b32.xlu1 %v867_v57, %s2631_s15 }
 0x4b7   : > { %v3083_v14 = vpop.f32.mrb[0].mxu1 }
 0x4b8   : > { %v2024_v16 = vpop.f32.mrb[1].mxu1 }
 0x4bc   : > { %v884_v18 = vpop.permute.xlu0 %883 }
 0x4bd   : > { %v886_v19 = vadd.f32 %v884_v18, %v880_v17  ;;  %v865_v17 = vld [vmem:[#allocation10 + $0x30] sm:$0xff]  ;;  %v866_v18 = vld [vmem:[#allocation10 + $0x38] sm:$0xff] }
 0x4bf   : > { %888 = vrot.lane.b32.xlu0 %v886_v19, %s2624_s22  ;;  %v2140_v19 = vpack.c.bf16 %v866_v18, %v865_v17 }
 0x4c3   : > { %1135 = vrot.lane.b32.xlu0 %v3065_v55, %s2625_s5  ;;  %s3363_s5 = sld [smem:[#allocation24_spill]] }
 0x4c7   : > { %1139 = vrot.lane.b32.xlu0 %v830_v58, %s2632_s19 }
 0x4c9   : > { %v1663_v10 = vld [vmem:[%s3363_s5 + $0x58] sm:$0xff]  ;;  %v1666_v17 = vld [vmem:[%s3363_s5 + $0x70] sm:$0xff] }
 0x4ca   : > { %v1667_v18 = vld [vmem:[%s3363_s5 + $0x78] sm:$0xff] }
 0x4d4   : > { %v892_v20 = vpop.permute.xlu1 %891 }
 0x4d5   : > { %2026 = vmatpush3.xpose.msk.msra.mxu0 %vm893_vm4, %v892_v20 }
 0x4d6   : > { %2030 = vmatprep.subr.mxu0 %v2623_v12 }
 0x4d8   : > { %v1133_v22 = vpop.permute.xlu1 %1132 }
 0x531   : > { %v889_v21 = vpop.permute.xlu0 %888 }
 0x532   : > { %2028 = vmatmul.mubr.msk.f32.vlgmr.msra.gmra.mrb[4].mxu0 %vm893_vm4, %v889_v21 }
 0x533   : > { %2031 = vmatpush3.xpose.msk.msra.mxu0 %vm636_vm2, %v3083_v14  ;;  %2032 = vmatprep.mubr.msk.f32.mxu0 %vm2622_vm1, %v2623_v12 }
 0x534   : > { %2050 = vmatprep.subr.mxu0 %v2623_v12 }
 0x535   : > { %v1136_v23 = vpop.permute.xlu0 %1135 }
 0x536   : > { %v1138_v24 = vsel %vm841_vm3, %v1133_v22, %v1136_v23 }
 0x537   : > { %v1143_v25 = vmul.f32 %v1138_v24, %v831_v63 }
 0x539   : > { %1145 = vrot.lane.b32.xlu0 %v1143_v25, %s2632_s19  ;;  %v1140_v40 = vpop.permute.xlu0 %1139 }
 0x53a   : > { %2033 = vmatmul.mubr.msk.f32.vlgmr.msra.gmra.mrb[4].mxu0 %vm636_vm2, %v3065_v55  ;;  %v1142_v42 = vmul.f32 %v1140_v40, %v3065_v55  ;;  %v1562_v40 = vld [vmem:[%s3362_s16 + $0x40] sm:$0xff] }
 0x53b   : > { %2052 = vmatprep.mubr.msk.f32.mxu0 %vm2622_vm1, %v2623_v12 }
 0x5ab   : > { %v1146_v41 = vpop.permute.xlu0 %1145 }
 0x5ac   : > { %v1148_v43 = vadd.f32 %v1146_v41, %v1142_v42  ;;  %v1564_v41 = vld [vmem:[%s3362_s16 + $0x50] sm:$0xff] }
 0x5ad   : > { %v2158_v42 = vpack.c.bf16 %v1564_v41, %v1562_v40 }
 0x60d   : > { %v1039_v29 = vpop.f32.mrb[4].mxu0 }
 0x60e   : > { %v1043_v30 = vmul.f32 0.14433756, %v1039_v29  ;;  %v2034_v31 = vpop.f32.mrb[5].mxu0  ;;  %v1556_v29 = vld [vmem:[%s3362_s16 + $0x10] sm:$0xff] }
 0x60f   : > { %v1559_v31 = vld [vmem:[%s3362_s16 + $0x28] sm:$0xff] }
 0x610   : > { %v1044_v32 = vsel %vm858_vm5, %v1043_v30, -1e+30 }
 0x611   : > { %v1045_v33 = vsel %vm841_vm3, %v1044_v32, -inf }
 0x612   : > { %1046 = vmax.xlane.f32.xlu1 %v1045_v33 }
 0x623   : > { %1056 = vrot.lane.b32.xlu1 %v3083_v14, %s2624_s22  ;;  %s2633_s22 = smov 48  }
 0x627   : > { %1226 = vrot.lane.b32.xlu1 %v3083_v14, %s2629_s10 }
 0x62b   : > { %1224 = vrot.lane.b32.xlu1 %v3065_v55, %s2632_s19  ;;  %v2146_v55 = vpack.c.bf16 %v862_v53, %v861_v52  ;;  %v1919_v53 = vld [vmem:[#allocation11] ss:$0 sm:$0xff]  ;;  %s2532_s19 = scalar_lea.vmem %s3270_s13, 128 }
 0x62c   : > { %p2533_p6 = scmp.ne.s32.totalorder %s3270_s13, %s2532_s19 }
 0x62e   : > { %p2534_p4 = pnand %p2533_p6, %p3365_p9 }
 0x630   : > { %p2535_p13 = pneg %p2534_p4 }
 0x69f   : > { %v1047_v34 = vpop.xlane.xlu1 %1046 }
 0x6a0   : > { %v1048_v35 = vsub.f32 %v1044_v32, %v1047_v34  ;;  %v1561_v32 = vld [vmem:[%s3362_s16 + $0x38] sm:$0xff]  ;;  %v1558_v34 = vld [vmem:[%s3362_s16 + $0x20] sm:$0xff] }
 0x6a1   : > { %v2152_v33 = vpack.c.bf16 %v1561_v32, %v1559_v31 }
 0x6a2   : > { %v1049_v36 = vmul.f32 1.442695, %v1048_v35  ;;  %v1560_v35 = vld [vmem:[%s3362_s16 + $0x30] sm:$0xff] }
 0x6a3   : > { %v1057_v37 = vpop.permute.xlu1 %1056 }
 0x6a4   : > { %2320 = vpow2.f32 %v1049_v36  ;;  %2036 = vmatpush3.msra.mxu1 %v1057_v37  ;;  %v2154_v36 = vpack.c.bf16 %v1560_v35, %v1558_v34  ;;  %v1563_v37 = vld [vmem:[%s3362_s16 + $0x48] sm:$0xff] }
 0x6a5   : > { %2040 = vmatprep.subr.mxu1 %v2623_v12 }
 0x6a7   : > { %v1227_v48 = vpop.permute.xlu1 %1226 }
 0x6ab   : > { %v1225_v54 = vpop.permute.xlu1 %1224 }
 0x6ae   : > { %v2321_v38 = vpop.eup %2320 }
 0x6af   : > { %v1051_v39 = vsel %vm841_vm3, %v2321_v38, 0.0 }
 0x6b0   : > { %1052 = vadd.xlane.f32.xlu0 %v1051_v39 }
 0x6c6   : > { %1150 = vrot.lane.b32.xlu0 %v1148_v43, %s2633_s22  ;;  %v1567_v43 = vld [vmem:[%s3362_s16 + $0x68] sm:$0xff]  ;;  %s2536_s22 = sshll.u32 %s2634_s20, 4  ;;  %s2537_s22 = int_to_ptr.vmem [resolvable:$false] %s2536_s22 }
 0x6c7   : > { %s2538_s29 = scalar_lea.vmem %s2537_s22, 256  ;;  %p2539_p1 = scmp.lt.s32.totalorder %s3270_s13, %s2537_s22 }
 0x6c8   : > { %p2540_p3 = scmp.lt.s32.totalorder %s2538_s29, %s2532_s19 }
 0x6ca   : > { %p2541_p2 = por %p2540_p3, %p2539_p1 }
 0x6cc   : > { %p2542_p0 = pnand %p2541_p2, %p2535_p13 }
 0x73d   : > { %v1053_v44 = vpop.xlane.xlu0 %1052 }
 0x73e   : > { %2322 = vrcp.f32 %v1053_v44  ;;  %v1569_v44 = vld [vmem:[%s3362_s16 + $0x78] sm:$0xff] }
 0x741   : > { %v1151_v47 = vpop.permute.xlu0 %1150 }
 0x748   : > { %v2323_v45 = vpop.eup %2322 }
 0x749   : > { %v1055_v46 = vmul.f32 %v2323_v45, %v2321_v38  ;;  %v1565_v38 = vld [vmem:[%s3362_s16 + $0x58] sm:$0xff]  ;;  %v2160_v45 = vpack.c.bf16 %v1569_v44, %v1567_v43 }
 0x74a   : > { %v2156_v39 = vpack.c.bf16 %v1565_v38, %v1563_v37 }
 0x74b   : > { %2038 = vmatmul.mubr.msk.f32.vlgmr.msra.gmra.mrb[2].mxu1 %vm841_vm3, %v1055_v46  ;;  %v1566_v46 = vld [vmem:[%s3362_s16 + $0x60] sm:$0xff] }
 0x74c   : > { %2041 = vmatpush3.xpose.msk.msra.mxu1 %vm893_vm4, %v892_v20  ;;  %2042 = vmatprep.mubr.msk.f32.mxu1 %vm2622_vm1, %v2623_v12 }
 0x74d   : > { %2045 = vmatprep.subr.mxu1 %v2623_v12 }
 0x74f   : > { %2043 = vmatmul.mubr.msk.f32.vlgmr.msra.gmra.mrb[4].mxu1 %vm893_vm4, %v1151_v47  ;;  %v1568_v47 = vld [vmem:[%s3362_s16 + $0x70] sm:$0xff] }
 0x750   : > { %2046 = vmatpush3.xpose.msk.msra.mxu1 %vm636_vm2, %v1227_v48  ;;  %2047 = vmatprep.mubr.msk.f32.mxu1 %vm2622_vm1, %v2623_v12  ;;  %v2162_v48 = vpack.c.bf16 %v1568_v47, %v1566_v46 }
 0x751   : > { %2142 = vmatprep.subr.bf16.mxu1 %v2621_v6 }
 0x757   : > { %2048 = vmatmul.mubr.msk.f32.vlgmr.msra.gmra.mrb[4].mxu1 %vm636_vm2, %v1225_v54 }
 0x758   : > { %2144 = vmatpush3.bf16.msra.mxu1 %v2143_v51  ;;  %2074 = vmatprep.mubr.msk.f32.mxu1 %vm2622_vm1, %v2623_v12 }
 0x759   : > { %2145 = vmatprep.subr.bf16.mxu1 %v2621_v6 }
 0x75c   : > { %2147 = vmatpush3.bf16.msra.mxu1 %v2146_v55 }
 0x75d   : > { %2164 = vmatprep.subr.bf16.mxu1 %v2621_v6 }
 0x81e   : > { %v1128_v56 = vpop.f32.mrb[2].mxu1 }
 0x81f   : > { %v2039_v57 = vpop.f32.mrb[3].mxu1  ;;  %2075 = vmatmul.mubr.msk.f32.vlgmr.msra.gmra.mrb[6].mxu1 %vm636_vm2, %v1128_v56  ;;  %v1652_v56 = vld [vmem:[%s3363_s5] sm:$0xff] }
 0x820   : > { %2109 = vmatprep.mubr.msk.f32.mxu1 %vm2622_vm1, %v2623_v12  ;;  %v1653_v57 = vld [vmem:[%s3363_s5 + $0x8] sm:$0xff] }
 0x82a   : > { %v1298_v58 = vpop.f32.mrb[4].mxu1 }
 0x82b   : > { %v1302_v59 = vmul.f32 0.14433756, %v1298_v58  ;;  %v2049_v60 = vpop.f32.mrb[5].mxu1  ;;  %v2165_v58 = vpack.c.bf16 %v1653_v57, %v1652_v56 }
 0x82c   : > { %v1655_v60 = vld [vmem:[%s3363_s5 + $0x18] sm:$0xff] }
 0x82d   : > { %v1303_v61 = vsel %vm858_vm5, %v1302_v59, -1e+30  ;;  %2166 = vmatpush3.bf16.msra.mxu1 %v2165_v58  ;;  %v1654_v59 = vld [vmem:[%s3363_s5 + $0x10] sm:$0xff] }
 0x82e   : > { %v1304_v62 = vsel %vm841_vm3, %v1303_v61, -inf  ;;  %2167 = vmatprep.subr.bf16.mxu1 %v2621_v6 }
 0x82f   : > { %1305 = vmax.xlane.f32.xlu1 %v1304_v62  ;;  %v1656_v62 = vld [vmem:[%s3363_s5 + $0x20] sm:$0xff] }
 0x8bc   : > { %v1306_v63 = vpop.xlane.xlu1 %1305 }
 0x8bd   : > { %v1307_v1 = vsub.f32 %v1303_v61, %v1306_v63  ;;  %v2168_v61 = vpack.c.bf16 %v1655_v60, %v1654_v59  ;;  %v1657_v63 = vld [vmem:[%s3363_s5 + $0x28] sm:$0xff] }
 0x8bf   : > { %v1308_v2 = vmul.f32 1.442695, %v1307_v1  ;;  %2169 = vmatpush3.bf16.msra.mxu1 %v2168_v61  ;;  %v2171_v1 = vpack.c.bf16 %v1657_v63, %v1656_v62 }
 0x8c0   : > { %2170 = vmatprep.subr.bf16.mxu1 %v2621_v6 }
 0x8c1   : > { %2324 = vpow2.f32 %v1308_v2  ;;  %v1658_v2 = vld [vmem:[%s3363_s5 + $0x30] sm:$0xff] }
 0x8c3   : > { %2172 = vmatpush3.bf16.msra.mxu1 %v2171_v1 }
 0x8c4   : > { %2173 = vmatprep.subr.bf16.mxu1 %v2621_v6 }
 0x8cb   : > { %v2325_v3 = vpop.eup %2324 }
 0x8cc   : > { %v1310_v4 = vsel %vm841_vm3, %v2325_v3, 0.0 }
 0x8cd   : > { %1311 = vadd.xlane.f32.xlu0 %v1310_v4 }
 0x8e3   : > { %1315 = vrot.lane.b32.xlu0 %v3083_v14, %s2630_s21  ;;  %s3364_s21 = sld [smem:[#allocation25_spill]] }
 0x8e9   : > { %s3268_s15 = scalar_lea.hbm %s3364_s21, %s1923_s9 }
 0x8f2   : > { %v1533_v5 = vpop.f32.mrb[6].mxu1 }
 0x8f3   : > { %v2076_v7 = vpop.f32.mrb[7].mxu1 }
 0x8f4   : > { %v1661_v7 = vld [vmem:[%s3363_s5 + $0x48] sm:$0xff] }
 0x95a   : > { %v1312_v8 = vpop.xlane.xlu0 %1311 }
 0x95b   : > { %2326 = vrcp.f32 %v1312_v8 }
 0x95e   : > { %v1316_v9 = vpop.permute.xlu0 %1315 }
 0x95f   : > { %2051 = vmatpush3.msra.mxu0 %v1316_v9  ;;  %v1662_v9 = vld [vmem:[%s3363_s5 + $0x50] sm:$0xff] }
 0x960   : > { %2136 = vmatprep.subr.bf16.mxu0 %v2621_v6  ;;  %v2180_v11 = vpack.c.bf16 %v1663_v10, %v1662_v9 }
 0x965   : > { %v2327_v13 = vpop.eup %2326 }
 0x966   : > { %v1314_v16 = vmul.f32 %v2327_v13, %v2325_v3  ;;  %v1659_v3 = vld [vmem:[%s3363_s5 + $0x38] sm:$0xff]  ;;  %v1664_v13 = vld [vmem:[%s3363_s5 + $0x60] sm:$0xff] }
 0x967   : > { %v2174_v4 = vpack.c.bf16 %v1659_v3, %v1658_v2 }
 0x968   : > { %2053 = vmatmul.mubr.msk.f32.vlgmr.msra.gmra.mrb[6].mxu0 %vm841_vm3, %v1314_v16 }
 0x969   : > { %2138 = vmatpush3.bf16.msra.mxu0 %v2137_v15  ;;  %2063 = vmatprep.mubr.msk.f32.mxu0 %vm2622_vm1, %v2623_v12  ;;  %v1665_v15 = vld [vmem:[%s3363_s5 + $0x68] sm:$0xff] }
 0x96a   : > { %2139 = vmatprep.subr.bf16.mxu0 %v2621_v6  ;;  %2175 = vmatpush3.bf16.msra.mxu1 %v2174_v4  ;;  %v2183_v16 = vpack.c.bf16 %v1665_v15, %v1664_v13 }
 0x96b   : > { %2176 = vmatprep.subr.bf16.mxu1 %v2621_v6 }
 0x96d   : > { %2141 = vmatpush3.bf16.msra.mxu0 %v2140_v19  ;;  %v2186_v19 = vpack.c.bf16 %v1667_v18, %v1666_v17 }
 0xa3b   : > { %v1387_v14 = vpop.f32.mrb[6].mxu0 }
 0xa3c   : > { %v2054_v20 = vpop.f32.mrb[7].mxu0  ;;  %2064 = vmatmul.mubr.msk.f32.vlgmr.msra.gmra.mrb[8].mxu0 %vm636_vm2, %v1387_v14 }
 0xa3d   : > { %1637 = vmatprep.mubr.f32.mxu0 %v2623_v12  ;;  %v1557_v12 = vld [vmem:[%s3362_s16 + $0x18] sm:$0xff] }
 0xa3e   : > { %v2148_v28 = vpack.c.bf16 %v1557_v12, %v1555_v27 }
 0xa40   : > { %2149 = vmatprep.subr.bf16.mxu0 %v2148_v28 }
 0xb0f   : > { %v1460_v21 = vpop.f32.mrb[8].mxu0 }
 0xb10   : > { %v1534_v22 = vadd.f32 %v1533_v5, %v1460_v21  ;;  %v2065_v23 = vpop.f32.mrb[9].mxu0  ;;  %v1660_v5 = vld [vmem:[%s3363_s5 + $0x40] sm:$0xff] }
 0xb11   : > { %v2177_v8 = vpack.c.bf16 %v1661_v7, %v1660_v5 }
 0xb12   : > { %v3151_v24 = vadd.f32 %v1534_v22, %v2987_v0  ;;  %v1554_v0 = vld [vmem:[%s3362_s16] sm:$0xff] }
 0xb13   : > { %v2150_v30 = vpack.c.bf16 %v1556_v29, %v1554_v0  ;;  %2178 = vmatpush3.bf16.msra.mxu1 %v2177_v8 }
 0xb14   : > { %v1538_v25 = vmul.f32 %v3151_v24, %v3151_v24  ;;  %2179 = vmatprep.subr.bf16.mxu1 %v2621_v6 }
 0xb15   : > { %2151 = vmatpush1.bf16.msra.mxu0 %v2150_v30 }
 0xb16   : > { %v1539_v26 = vsel %vm537_vm0, %v1538_v25, 0.0  ;;  %2153 = vmatprep.subr.bf16.mxu0 %v2152_v33 }
 0xb17   : > { %1540 = vadd.xlane.f32.xlu1 %v1539_v26  ;;  %2181 = vmatpush3.bf16.msra.mxu1 %v2180_v11 }
 0xb18   : > { %2182 = vmatprep.subr.bf16.mxu1 %v2621_v6 }
 0xb19   : > { %2155 = vmatpush1.bf16.msra.mxu0 %v2154_v36 }
 0xb1a   : > { %2157 = vmatprep.subr.bf16.mxu0 %v2156_v39 }
 0xb1b   : > { %2184 = vmatpush3.bf16.msra.mxu1 %v2183_v16 }
 0xb1c   : > { %2185 = vmatprep.subr.bf16.mxu1 %v2621_v6 }
 0xb1d   : > { %2159 = vmatpush1.bf16.msra.mxu0 %v2158_v42 }
 0xb1e   : > { %2161 = vmatprep.subr.bf16.mxu0 %v2160_v45 }
 0xb1f   : > { %2187 = vmatpush3.bf16.msra.mxu1 %v2186_v19 }
 0xb21   : > { %2163 = vmatpush1.bf16.msra.mxu0 %v2162_v48 }
 0xba4   : > { %v1541_v49 = vpop.xlane.xlu1 %1540 }
 0xba5   : > { %v1542_v50 = vmul.f32 0.015625, %v1541_v49 }
 0xba7   : > { %v1544_v51 = vadd.f32 1e-06, %v1542_v50 }
 0xba9   : > { %2328 = vrsqrt.f32 %v1544_v51 }
 0xbb3   : > { %v2329_v52 = vpop.eup %2328 }
 0xbb4   : > { %v1546_v54 = vmul.f32 %v2329_v52, %v3151_v24 }
 0xbb6   : > { %v1553_v55 = vmul.f32 %v1919_v53, %v1546_v54 }
 0xbb8   : > { %1920 = vmatmul.mubr.msk.f32.vlgmr.msra.gmra.mrb[10].mxu0 %vm537_vm0, %v1553_v55 }
 0xc8b   : > { %v1639_v14 = vpop.f32.mrb[10].mxu0 }
 0xc8c   : > { %v1921_v20 = vmul.f32 -1.442695, %v1639_v14  ;;  %v1641_v21 = vpop.f32.mrb[11].mxu0 }
 0xc8e   : > { %2330 = vpow2.f32 %v1921_v20 }
 0xc98   : > { %v2331_v22 = vpop.eup %2330 }
 0xc99   : > { %v1647_v23 = vadd.f32 1.0, %v2331_v22 }
 0xc9b   : > { %2332 = vrcp.f32 %v1647_v23 }
 0xca5   : > { %v2333_v6 = vpop.eup %2332 }
 0xca6   : > { %v1650_v25 = vmul.f32 %v2333_v6, %v1639_v14 }
 0xca8   : > { %v1651_v26 = vmul.f32 %v1650_v25, %v1641_v21 }
 0xcaa   : > { %2110 = vmatmul.mubr.f32.vlgmr.msra.gmra.mrb[8].mxu1 %v1651_v26 }
 0xd7d   : > { %v1734_v27 = vpop.f32.mrb[8].mxu1 }
 0xd7e   : > { %v1738_v12 = vadd.f32 %v1734_v27, %v3151_v24  ;;  %v2111_v28 = vpop.f32.mrb[9].mxu1 }
 0xd80   : > { %1739 = vst.msk [vmem:[%s534_s23] sm:$0xff] %vm537_vm0, %v1738_v12 }
 0xd81   : > { %2545 = shalt.err (!%p2542_p0)
}
 0xd82   : > { %s2546_s6 = scalar_lea.hbm %s3268_s15, 128  ;;  %s2550_s3 = scalar_lea.hbm %s3364_s21, 256 }
 0xd83   : > { %p2547_p10 = scmp.ne.s32.totalorder %s3268_s15, %s2546_s6  ;;  %p2551_p8 = scmp.lt.u32.totalorder %s3268_s15, %s3364_s21 }
 0xd84   : > { %p2552_p5 = scmp.lt.u32.totalorder %s2550_s3, %s2546_s6  ;;  %p2554_p6 = scmp.lt.u32.totalorder %s2546_s6, %s3268_s15 }
 0xd85   : > { %p2548_p11 = pnand %p2547_p10, %p3365_p9 }
 0xd86   : > { %p2553_p7 = por %p2552_p5, %p2551_p8 }
 0xd87   : > { %p2549_p12 = pneg %p2548_p11 }
 0xd88   : > { %p2555_p4 = por %p2554_p6, %p2553_p7 }
 0xd8a   : > { %p2556_p13 = pnand %p2555_p4, %p2549_p12 }
 0xd8c   : > { %2559 = shalt.err (!%p2556_p13)
}
 0xd8d   : > { %2218 = dma.vmem_to_hbm [thread:$0]  (%p3365_p9), %s3270_s13, 128, %s3268_s15, %s1741_s14  }
 0xd8e PF: > { %s1766_s19 = sand.u32 1, %s2598_s25   ;;  %p3366_p1 = scmp.ne.s32.totalorder %s3353_s17, 0 }
 0xd8f   : > { %p3367_p3 = scmp.ge.s32.totalorder %s2610_s28, 2  ;;  %s1767_s22 = scalar_lea.sflag [#allocation4], %s1766_s19 }
 0xd91   : > { %p2244_p2 = pnand %p3367_p3, %p3366_p1 }
 0xd93   : > { %2593 = dma.done.wait (!%p2244_p2), %s1767_s22, 128  }
 0xd94   : > { %2595 = vsyncadd (!%p2244_p2), %s1767_s22, 4294967168  ;;  %p29_p0 = scmp.ge.s32.totalorder %s2889_s18, 4   ;;  %s3368_s25 = smov %s2602_s26 }
 0xd95   : > { %s3369_s26 = smov %s2606_s27  ;;  %s3370_s27 = smov %s2900_s24 }
 0xd96   : > { %s3371_s28 = smov %s2889_s18  ;;  %31 = sbr.rel (!%p29_p0) target bundleno = 15 (0xf), region = 141 }
 0xd9d   :  { %1772 = vsyncpa [#allocation3], 1 }
 0xd9e   :  { %1774 = vsyncpa [#allocation3 + $0x1], 1 }
 0xd9f   :  { %1775 = vsyncpa [#allocation6], 1 }
 0xda0   :  { %1776 = vsyncpa [#allocation9], 1 }
 0xda1   :  { %1777 = vsyncpa [#allocation12], 1 }
 0xda2   :  { %1778 = vsyncpa [#allocation4], 1 }
 0xda3   :  { %1780 = vsyncpa [#allocation4 + $0x1], 1 }

</bundles_post_ra>
